<compile_context>
chip_gen: v7x
topology: tpu7x:2x2x1
jax: 0.10.0
libtpu: 0.0.40
codegen_flags: <defaults>
</compile_context>

<pallas_src>
import functools

import jax
import jax.numpy as jnp
from jax.experimental import pallas as pl
from jax.experimental.pallas import tpu as pltpu

DIM = 256            # GIN hidden dim / BN channels
OUTPUT_DIM = 128     # fc1_xd output
NUM_FEATURES_XD = 128
FC1_DIM = 1024
FC2_DIM = 256
N_OUTPUT = 1
NUM_GIN_LAYERS = 6
BN_EPS = 1e-5
OUT_PAD = 128        # lane-dense padding of the final 1-column output


# ----------------------------------------------------------------------------
# Fused kernel body: grid axis = 6 GIN layers + 1 head step, h carried in scratch
# ----------------------------------------------------------------------------
def _fused_kernel(adj_ref, x_ref, w1_ref, w2_ref, vec_ref, pool_ref,
                  wxd_ref, wf1_ref, wf2_ref, wo_ref, hb_ref,
                  o_ref, h_ref):
    l = pl.program_id(0)

    @pl.when(l == 0)
    def _():
        # node features (bf16, already padded to DIM channels) -> f32 carry scratch
        h_ref[...] = x_ref[...].astype(jnp.float32)

    @pl.when(l < NUM_GIN_LAYERS)
    def _():
        h16 = h_ref[...].astype(jnp.bfloat16)
        # GIN sum aggregation + self term: (A + I) @ h  (self-loops folded into adj)
        agg = jnp.dot(adj_ref[...], h16, preferred_element_type=jnp.float32)
        # GIN MLP: Linear -> ReLU -> Linear, then the outer F.relu
        z = jnp.dot(agg.astype(jnp.bfloat16), w1_ref[0],
                    preferred_element_type=jnp.float32) + vec_ref[0, 0]
        z = jnp.maximum(z, 0.0)
        z = jnp.dot(z.astype(jnp.bfloat16), w2_ref[0],
                    preferred_element_type=jnp.float32) + vec_ref[0, 1]
        z = jnp.maximum(z, 0.0)
        # BatchNorm1d (inference) folded to per-channel scale/shift
        h_ref[...] = z * vec_ref[0, 2] + vec_ref[0, 3]

    @pl.when(l == NUM_GIN_LAYERS)
    def _():
        # global_add_pool: P @ h, P[g, n] = 1 iff node n belongs to graph g
        pooled = jnp.dot(pool_ref[...], h_ref[...].astype(jnp.bfloat16),
                         preferred_element_type=jnp.float32)
        g = jnp.dot(pooled.astype(jnp.bfloat16), wxd_ref[...],
                    preferred_element_type=jnp.float32) + hb_ref[0, :OUTPUT_DIM]
        g = jnp.maximum(g, 0.0)                    # dropout = identity at inference
        g = jnp.dot(g.astype(jnp.bfloat16), wf1_ref[...],
                    preferred_element_type=jnp.float32) + hb_ref[1, :]
        g = jnp.maximum(g, 0.0)
        g = jnp.dot(g.astype(jnp.bfloat16), wf2_ref[...],
                    preferred_element_type=jnp.float32) + hb_ref[2, :FC2_DIM]
        g = jnp.maximum(g, 0.0)
        # final Linear(256, 1), zero-padded to 128 output lanes for a dense store
        o_ref[...] = jnp.dot(g.astype(jnp.bfloat16), wo_ref[...],
                             preferred_element_type=jnp.float32) + hb_ref[3, :OUT_PAD]


def _const_spec(shape):
    nd = len(shape)
    return pl.BlockSpec(shape, lambda l, _nd=nd: (0,) * _nd)


def _layer_spec(shape):
    # Block indexed along the leading (layer) axis; clamp so the head step (l == 6)
    # revisits layer 5's block instead of fetching anything new.
    nd = len(shape)
    return pl.BlockSpec(
        shape,
        lambda l, _nd=nd: (jnp.minimum(l, NUM_GIN_LAYERS - 1),) + (0,) * (_nd - 1))


# ----------------------------------------------------------------------------
# Parameters (deterministic, in-script) — same layout as the PyTorch module
# ----------------------------------------------------------------------------
def init_params(key):
    params = {"gin": [], "head": {}}
    scale = 0.05
    for layer in range(NUM_GIN_LAYERS):
        in_dim = NUM_FEATURES_XD if layer == 0 else DIM
        key, k1, k2 = jax.random.split(key, 3)
        params["gin"].append(dict(
            w1=jax.random.normal(k1, (in_dim, DIM), jnp.float32) * scale,
            b1=jnp.zeros((1, DIM), jnp.float32),
            w2=jax.random.normal(k2, (DIM, DIM), jnp.float32) * scale,
            b2=jnp.zeros((1, DIM), jnp.float32),
            # BatchNorm1d defaults: weight=1, bias=0, running_mean=0, running_var=1
            gamma=jnp.ones((1, DIM), jnp.float32),
            beta=jnp.zeros((1, DIM), jnp.float32),
            mean=jnp.zeros((1, DIM), jnp.float32),
            var=jnp.ones((1, DIM), jnp.float32),
        ))
    key, kxd, kf1, kf2, ko = jax.random.split(key, 5)
    params["head"] = dict(
        w_xd=jax.random.normal(kxd, (DIM, OUTPUT_DIM), jnp.float32) * scale,
        b_xd=jnp.zeros((1, OUTPUT_DIM), jnp.float32),
        w_fc1=jax.random.normal(kf1, (OUTPUT_DIM, FC1_DIM), jnp.float32) * scale,
        b_fc1=jnp.zeros((1, FC1_DIM), jnp.float32),
        w_fc2=jax.random.normal(kf2, (FC1_DIM, FC2_DIM), jnp.float32) * scale,
        b_fc2=jnp.zeros((1, FC2_DIM), jnp.float32),
        w_out=jax.random.normal(ko, (FC2_DIM, N_OUTPUT), jnp.float32) * scale,
        b_out=jnp.zeros((1, N_OUTPUT), jnp.float32),
    )
    return params


def pack_params(params):
    """One-time (model-load) packing into the fused kernel's layout."""
    gin = params["gin"]
    w1, vecs = [], []
    for lp in gin:
        w = lp["w1"]
        if w.shape[0] < DIM:                       # layer 0: [128, 256] -> [256, 256]
            w = jnp.pad(w, ((0, DIM - w.shape[0]), (0, 0)))
        w1.append(w)
        scale = (lp["gamma"] * jax.lax.rsqrt(lp["var"] + BN_EPS)).reshape(DIM)
        shift = (lp["beta"].reshape(DIM) - lp["mean"].reshape(DIM) * scale)
        vecs.append(jnp.stack([lp["b1"].reshape(DIM), lp["b2"].reshape(DIM),
                               scale, shift]))     # [4, 256]
    hp = params["head"]
    hb = jnp.zeros((4, FC1_DIM), jnp.float32)
    hb = hb.at[0, :OUTPUT_DIM].set(hp["b_xd"].reshape(-1))
    hb = hb.at[1, :].set(hp["b_fc1"].reshape(-1))
    hb = hb.at[2, :FC2_DIM].set(hp["b_fc2"].reshape(-1))
    hb = hb.at[3, :N_OUTPUT].set(hp["b_out"].reshape(-1))
    return dict(
        w1=jnp.stack(w1).astype(jnp.bfloat16),                         # [6, 256, 256]
        w2=jnp.stack([lp["w2"] for lp in gin]).astype(jnp.bfloat16),   # [6, 256, 256]
        vecs=jnp.stack(vecs),                                          # [6, 4, 256] f32
        w_xd=hp["w_xd"].astype(jnp.bfloat16),                          # [256, 128]
        w_fc1=hp["w_fc1"].astype(jnp.bfloat16),                        # [128, 1024]
        w_fc2=hp["w_fc2"].astype(jnp.bfloat16),                        # [1024, 256]
        w_out=jnp.pad(hp["w_out"],
                      ((0, 0), (0, OUT_PAD - N_OUTPUT))).astype(jnp.bfloat16),  # [256,128]
        head_bias=hb,                                                  # [4, 1024] f32
    )


# ----------------------------------------------------------------------------
# Forward pass wrapper (takes pre-packed params)
# ----------------------------------------------------------------------------
@functools.partial(jax.jit, static_argnames=("num_graphs",))
def molecular_graph_network(x, edge_index, batch, packed, *, num_graphs):
    n = x.shape[0]
    n_pad = ((n + 127) // 128) * 128        # lane-dense / full-K MXU tiles
    b_pad = ((num_graphs + 7) // 8) * 8

    # adjacency at padded size with GIN self-loops folded into the edge list:
    # (A + I)[dst, src]; single scatter-add, single bf16 cast. Padded rows/cols stay 0.
    idx = jnp.arange(n, dtype=edge_index.dtype)
    src = jnp.concatenate([edge_index[0], idx])
    dst = jnp.concatenate([edge_index[1], idx])
    adj = jnp.zeros((n_pad, n_pad), jnp.float32).at[dst, src].add(1.0).astype(jnp.bfloat16)

    # node features zero-padded to DIM channels (matches zero-padded layer-0 W1), bf16
    x_pad = jnp.zeros((n_pad, DIM), jnp.bfloat16).at[:n, :x.shape[1]].set(
        x.astype(jnp.bfloat16))

    # global_add_pool selection matrix [b_pad, n_pad]; padded nodes match no graph
    batch_pad = jnp.full((n_pad,), -1, batch.dtype).at[:n].set(batch)
    pool = (batch_pad[None, :] ==
            jnp.arange(b_pad, dtype=batch.dtype)[:, None]).astype(jnp.bfloat16)

    args = (adj, x_pad, packed["w1"], packed["w2"], packed["vecs"], pool,
            packed["w_xd"], packed["w_fc1"], packed["w_fc2"], packed["w_out"],
            packed["head_bias"])

    in_specs = [
        _const_spec((n_pad, n_pad)),              # adj
        _const_spec((n_pad, DIM)),                # x
        _layer_spec((1, DIM, DIM)),               # w1 (per-layer block)
        _layer_spec((1, DIM, DIM)),               # w2 (per-layer block)
        _layer_spec((1, 4, DIM)),                 # b1/b2/scale/shift (per-layer block)
        _const_spec((b_pad, n_pad)),              # pool
        _const_spec((DIM, OUTPUT_DIM)),           # w_xd
        _const_spec((OUTPUT_DIM, FC1_DIM)),       # w_fc1
        _const_spec((FC1_DIM, FC2_DIM)),          # w_fc2
        _const_spec((FC2_DIM, OUT_PAD)),          # w_out
        _const_spec((4, FC1_DIM)),                # head biases
    ]

    out_pad = pl.pallas_call(
        _fused_kernel,
        out_shape=jax.ShapeDtypeStruct((b_pad, OUT_PAD), jnp.float32),
        grid=(NUM_GIN_LAYERS + 1,),
        in_specs=in_specs,
        out_specs=pl.BlockSpec((b_pad, OUT_PAD), lambda l: (0, 0)),
        scratch_shapes=[pltpu.VMEM((n_pad, DIM), jnp.float32)],   # carried h
        compiler_params=pltpu.CompilerParams(dimension_semantics=("arbitrary",)),
    )(*args)
    return out_pad[:num_graphs, :N_OUTPUT]


# ----------------------------------------------------------------------------
# Pure-JAX f32 reference (matches the PyTorch forward in eval mode)
# ----------------------------------------------------------------------------
def reference_forward(x, edge_index, batch, params, num_graphs):
    n = x.shape[0]
    src, dst = edge_index[0], edge_index[1]
    adj = jnp.zeros((n, n), jnp.float32).at[dst, src].add(1.0)
    h = x
    for lp in params["gin"]:
        agg = h + adj @ h
        z = jnp.maximum(agg @ lp["w1"] + lp["b1"], 0.0)
        z = jnp.maximum(z @ lp["w2"] + lp["b2"], 0.0)
        inv = jax.lax.rsqrt(lp["var"] + BN_EPS)
        h = (z - lp["mean"]) * inv * lp["gamma"] + lp["beta"]
    pool = (batch[None, :] == jnp.arange(num_graphs)[:, None]).astype(jnp.float32)
    pooled = pool @ h
    hp = params["head"]
    g = jnp.maximum(pooled @ hp["w_xd"] + hp["b_xd"], 0.0)
    g = jnp.maximum(g @ hp["w_fc1"] + hp["b_fc1"], 0.0)
    g = jnp.maximum(g @ hp["w_fc2"] + hp["b_fc2"], 0.0)
    return g @ hp["w_out"] + hp["b_out"]


# ----------------------------------------------------------------------------
if __name__ == "__main__":
    key = jax.random.PRNGKey(0)
    N, E, B = 64, 192, 2

    k_x, k_src, k_dst, k_p = jax.random.split(key, 4)
    x = jax.random.normal(k_x, (N, NUM_FEATURES_XD), jnp.float32)
    src = jax.random.randint(k_src, (E,), 0, N)
    dst = jax.random.randint(k_dst, (E,), 0, N)
    edge_index = jnp.stack([src, dst]).astype(jnp.int32)
    batch = jnp.concatenate([jnp.zeros(N // 2, jnp.int32),
                             jnp.ones(N - N // 2, jnp.int32)])

    params = init_params(k_p)
    packed = jax.tree_util.tree_map(jax.block_until_ready,
                                    pack_params(params))   # one-time, outside jit

    out = molecular_graph_network(x, edge_index, batch, packed, num_graphs=B)
    out = jax.block_until_ready(out)
    assert out.shape == (B, N_OUTPUT), out.shape
    assert bool(jnp.all(jnp.isfinite(out)))

    # tolerance check vs f32 reference (bf16 MXU inputs, f32 accumulation)
    ref = reference_forward(x, edge_index, batch, params, B)
    assert jnp.allclose(out, ref, rtol=1e-1, atol=5e-2), (out, ref)

    print("KERNEL_OK")
</pallas_src>

<mosaic_0001>
module attributes {stable_mosaic.version = 11 : i64} {
  func.func private @main(%arg0: i32) attributes {dimension_semantics = [#tpu.dimension_semantics<core_parallel>], iteration_bounds = array<i64: 2>, tpu.core_type = #tpu.core_type<sc_scalar_subcore>, window_params = []} {
    return
  }
}

module attributes {stable_mosaic.version = 11 : i64} {
  func.func private @main(%arg0: i32) attributes {dimension_semantics = [#tpu.dimension_semantics<core_parallel>], iteration_bounds = array<i64: 2>, tpu.core_type = #tpu.core_type<sc_scalar_subcore>, window_params = []} {
    return
  }
}

module attributes {stable_mosaic.version = 11 : i64} {
  func.func @_fused_kernel(%arg0: i32, %arg1: memref<128x128xbf16, #tpu.memory_space<vmem>>, %arg2: memref<128x256xbf16, #tpu.memory_space<vmem>>, %arg3: memref<1x256x256xbf16, #tpu.memory_space<vmem>>, %arg4: memref<1x256x256xbf16, #tpu.memory_space<vmem>>, %arg5: memref<1x4x256xf32, #tpu.memory_space<vmem>>, %arg6: memref<8x128xbf16, #tpu.memory_space<vmem>>, %arg7: memref<256x128xbf16, #tpu.memory_space<vmem>>, %arg8: memref<128x1024xbf16, #tpu.memory_space<vmem>>, %arg9: memref<1024x256xbf16, #tpu.memory_space<vmem>>, %arg10: memref<256x128xbf16, #tpu.memory_space<vmem>>, %arg11: memref<4x1024xf32, #tpu.memory_space<vmem>>, %arg12: memref<8x128xf32, #tpu.memory_space<vmem>>, %arg13: memref<128x256xf32, #tpu.memory_space<vmem>>) attributes {dimension_semantics = [#tpu.dimension_semantics<arbitrary>], iteration_bounds = array<i64: 7>, scalar_prefetch = 0 : i64, scratch_operands = 1 : i64, tpu.core_type = #tpu.core_type<tc>, window_params = [{pipeline_mode = #tpu.pipeline_mode<synchronous>, transform_indices = @transform_0, window_bounds = array<i64: 128, 128>}, {pipeline_mode = #tpu.pipeline_mode<synchronous>, transform_indices = @transform_1, window_bounds = array<i64: 128, 256>}, {transform_indices = @transform_2, window_bounds = array<i64: 1, 256, 256>}, {transform_indices = @transform_3, window_bounds = array<i64: 1, 256, 256>}, {transform_indices = @transform_4, window_bounds = array<i64: 1, 4, 256>}, {pipeline_mode = #tpu.pipeline_mode<synchronous>, transform_indices = @transform_5, window_bounds = array<i64: 8, 128>}, {pipeline_mode = #tpu.pipeline_mode<synchronous>, transform_indices = @transform_6, window_bounds = array<i64: 256, 128>}, {pipeline_mode = #tpu.pipeline_mode<synchronous>, transform_indices = @transform_7, window_bounds = array<i64: 128, 1024>}, {pipeline_mode = #tpu.pipeline_mode<synchronous>, transform_indices = @transform_8, window_bounds = array<i64: 1024, 256>}, {pipeline_mode = #tpu.pipeline_mode<synchronous>, transform_indices = @transform_9, window_bounds = array<i64: 256, 128>}, {pipeline_mode = #tpu.pipeline_mode<synchronous>, transform_indices = @transform_10, window_bounds = array<i64: 4, 1024>}, {pipeline_mode = #tpu.pipeline_mode<synchronous>, transform_indices = @transform_11, window_bounds = array<i64: 8, 128>}]} {
    %c0_i32 = arith.constant 0 : i32
    %0 = arith.cmpi eq, %arg0, %c0_i32 : i32
    %1 = arith.extui %0 : i1 to i32
    %c0_i32_0 = arith.constant 0 : i32
    %2 = arith.cmpi ne, %1, %c0_i32_0 : i32
    scf.if %2 {
      %c0 = arith.constant 0 : index
      %c0_4 = arith.constant 0 : index
      %9 = vector.load %arg2[%c0, %c0_4] : memref<128x256xbf16, #tpu.memory_space<vmem>>, vector<128x256xbf16>
      %10 = arith.extf %9 : vector<128x256xbf16> to vector<128x256xf32>
      %c0_5 = arith.constant 0 : index
      %c0_6 = arith.constant 0 : index
      %11 = vector.load %arg13[%c0_5, %c0_6] : memref<128x256xf32, #tpu.memory_space<vmem>>, vector<128x256xf32>
      tpu.vector_store %arg13[%c0_5, %c0_6], %10 {strides = array<i32>} : memref<128x256xf32, #tpu.memory_space<vmem>>, vector<128x256xf32>,
    } else {
    }
    %c6_i32 = arith.constant 6 : i32
    %3 = arith.cmpi slt, %arg0, %c6_i32 : i32
    %4 = arith.extui %3 : i1 to i32
    %c0_i32_1 = arith.constant 0 : i32
    %5 = arith.cmpi ne, %4, %c0_i32_1 : i32
    scf.if %5 {
      %c0 = arith.constant 0 : index
      %c0_4 = arith.constant 0 : index
      %9 = vector.load %arg13[%c0, %c0_4] : memref<128x256xf32, #tpu.memory_space<vmem>>, vector<128x256xf32>
      %10 = arith.truncf %9 : vector<128x256xf32> to vector<128x256xbf16>
      %c0_5 = arith.constant 0 : index
      %c0_6 = arith.constant 0 : index
      %11 = vector.load %arg1[%c0_5, %c0_6] : memref<128x128xbf16, #tpu.memory_space<vmem>>, vector<128x128xbf16>
      %cst = arith.constant dense<0.000000e+00> : vector<128x256xf32>
      %12 = tpu.matmul %11, %10, %cst {dimension_numbers = #tpu.dot_dimension_numbers<[1], [0], [0], [1], [0, 0, 1, 1], [], []>} : vector<128x128xbf16>, vector<128x256xbf16>, vector<128x256xf32> -> vector<128x256xf32>
      %13 = arith.truncf %12 : vector<128x256xf32> to vector<128x256xbf16>
      %c0_7 = arith.constant 0 : index
      %c0_8 = arith.constant 0 : index
      %c0_9 = arith.constant 0 : index
      %14 = vector.load %arg3[%c0_7, %c0_8, %c0_9] : memref<1x256x256xbf16, #tpu.memory_space<vmem>>, vector<1x256x256xbf16>
      %15 = vector.shape_cast %14 : vector<1x256x256xbf16> to vector<256x256xbf16>
      %cst_10 = arith.constant dense<0.000000e+00> : vector<128x256xf32>
      %16 = tpu.matmul %13, %15, %cst_10 {dimension_numbers = #tpu.dot_dimension_numbers<[1], [0], [0], [1], [0, 0, 1, 1], [], []>} : vector<128x256xbf16>, vector<256x256xbf16>, vector<128x256xf32> -> vector<128x256xf32>
      %c0_11 = arith.constant 0 : index
      %c0_12 = arith.constant 0 : index
      %c0_13 = arith.constant 0 : index
      %17 = vector.load %arg5[%c0_11, %c0_12, %c0_13] : memref<1x4x256xf32, #tpu.memory_space<vmem>>, vector<1x1x256xf32>
      %18 = vector.shape_cast %17 : vector<1x1x256xf32> to vector<256xf32>
      %19 = vector.shape_cast %18 : vector<256xf32> to vector<1x256xf32>
      %20 = vector.broadcast %19 : vector<1x256xf32> to vector<128x256xf32>
      %21 = arith.addf %16, %20 : vector<128x256xf32>
      %cst_14 = arith.constant 0.000000e+00 : f32
      %22 = vector.broadcast %cst_14 : f32 to vector<128x256xf32>
      %23 = arith.maximumf %21, %22 : vector<128x256xf32>
      %24 = arith.truncf %23 : vector<128x256xf32> to vector<128x256xbf16>
      %c0_15 = arith.constant 0 : index
      %c0_16 = arith.constant 0 : index
      %c0_17 = arith.constant 0 : index
      %25 = vector.load %arg4[%c0_15, %c0_16, %c0_17] : memref<1x256x256xbf16, #tpu.memory_space<vmem>>, vector<1x256x256xbf16>
      %26 = vector.shape_cast %25 : vector<1x256x256xbf16> to vector<256x256xbf16>
      %cst_18 = arith.constant dense<0.000000e+00> : vector<128x256xf32>
      %27 = tpu.matmul %24, %26, %cst_18 {dimension_numbers = #tpu.dot_dimension_numbers<[1], [0], [0], [1], [0, 0, 1, 1], [], []>} : vector<128x256xbf16>, vector<256x256xbf16>, vector<128x256xf32> -> vector<128x256xf32>
      %c0_19 = arith.constant 0 : index
      %c1 = arith.constant 1 : index
      %c0_20 = arith.constant 0 : index
      %28 = vector.load %arg5[%c0_19, %c1, %c0_20] : memref<1x4x256xf32, #tpu.memory_space<vmem>>, vector<1x1x256xf32>
      %29 = vector.shape_cast %28 : vector<1x1x256xf32> to vector<256xf32>
      %30 = vector.shape_cast %29 : vector<256xf32> to vector<1x256xf32>
      %31 = vector.broadcast %30 : vector<1x256xf32> to vector<128x256xf32>
      %32 = arith.addf %27, %31 : vector<128x256xf32>
      %cst_21 = arith.constant 0.000000e+00 : f32
      %33 = vector.broadcast %cst_21 : f32 to vector<128x256xf32>
      %34 = arith.maximumf %32, %33 : vector<128x256xf32>
      %c0_22 = arith.constant 0 : index
      %c2 = arith.constant 2 : index
      %c0_23 = arith.constant 0 : index
      %35 = vector.load %arg5[%c0_22, %c2, %c0_23] : memref<1x4x256xf32, #tpu.memory_space<vmem>>, vector<1x1x256xf32>
      %36 = vector.shape_cast %35 : vector<1x1x256xf32> to vector<256xf32>
      %37 = vector.shape_cast %36 : vector<256xf32> to vector<1x256xf32>
      %38 = vector.broadcast %37 : vector<1x256xf32> to vector<128x256xf32>
      %39 = arith.mulf %34, %38 : vector<128x256xf32>
      %c0_24 = arith.constant 0 : index
      %c3 = arith.constant 3 : index
      %c0_25 = arith.constant 0 : index
      %40 = vector.load %arg5[%c0_24, %c3, %c0_25] : memref<1x4x256xf32, #tpu.memory_space<vmem>>, vector<1x1x256xf32>
      %41 = vector.shape_cast %40 : vector<1x1x256xf32> to vector<256xf32>
      %42 = vector.shape_cast %41 : vector<256xf32> to vector<1x256xf32>
      %43 = vector.broadcast %42 : vector<1x256xf32> to vector<128x256xf32>
      %44 = arith.addf %39, %43 : vector<128x256xf32>
      %c0_26 = arith.constant 0 : index
      %c0_27 = arith.constant 0 : index
      %45 = vector.load %arg13[%c0_26, %c0_27] : memref<128x256xf32, #tpu.memory_space<vmem>>, vector<128x256xf32>
      tpu.vector_store %arg13[%c0_26, %c0_27], %44 {strides = array<i32>} : memref<128x256xf32, #tpu.memory_space<vmem>>, vector<128x256xf32>,
    } else {
    }
    %c6_i32_2 = arith.constant 6 : i32
    %6 = arith.cmpi eq, %arg0, %c6_i32_2 : i32
    %7 = arith.extui %6 : i1 to i32
    %c0_i32_3 = arith.constant 0 : i32
    %8 = arith.cmpi ne, %7, %c0_i32_3 : i32
    scf.if %8 {
      %c0 = arith.constant 0 : index
      %c0_4 = arith.constant 0 : index
      %9 = vector.load %arg6[%c0, %c0_4] : memref<8x128xbf16, #tpu.memory_space<vmem>>, vector<8x128xbf16>
      %c0_5 = arith.constant 0 : index
      %c0_6 = arith.constant 0 : index
      %10 = vector.load %arg13[%c0_5, %c0_6] : memref<128x256xf32, #tpu.memory_space<vmem>>, vector<128x256xf32>
      %11 = arith.truncf %10 : vector<128x256xf32> to vector<128x256xbf16>
      %cst = arith.constant dense<0.000000e+00> : vector<8x256xf32>
      %12 = tpu.matmul %9, %11, %cst {dimension_numbers = #tpu.dot_dimension_numbers<[1], [0], [0], [1], [0, 0, 1, 1], [], []>} : vector<8x128xbf16>, vector<128x256xbf16>, vector<8x256xf32> -> vector<8x256xf32>
      %13 = arith.truncf %12 : vector<8x256xf32> to vector<8x256xbf16>
      %c0_7 = arith.constant 0 : index
      %c0_8 = arith.constant 0 : index
      %14 = vector.load %arg7[%c0_7, %c0_8] : memref<256x128xbf16, #tpu.memory_space<vmem>>, vector<256x128xbf16>
      %cst_9 = arith.constant dense<0.000000e+00> : vector<8x128xf32>
      %15 = tpu.matmul %13, %14, %cst_9 {dimension_numbers = #tpu.dot_dimension_numbers<[1], [0], [0], [1], [0, 0, 1, 1], [], []>} : vector<8x256xbf16>, vector<256x128xbf16>, vector<8x128xf32> -> vector<8x128xf32>
      %c0_10 = arith.constant 0 : index
      %c0_11 = arith.constant 0 : index
      %16 = vector.load %arg11[%c0_10, %c0_11] : memref<4x1024xf32, #tpu.memory_space<vmem>>, vector<1x128xf32>
      %17 = vector.shape_cast %16 : vector<1x128xf32> to vector<128xf32>
      %18 = vector.shape_cast %17 : vector<128xf32> to vector<1x128xf32>
      %19 = vector.broadcast %18 : vector<1x128xf32> to vector<8x128xf32>
      %20 = arith.addf %15, %19 : vector<8x128xf32>
      %cst_12 = arith.constant 0.000000e+00 : f32
      %21 = vector.broadcast %cst_12 : f32 to vector<8x128xf32>
      %22 = arith.maximumf %20, %21 : vector<8x128xf32>
      %23 = arith.truncf %22 : vector<8x128xf32> to vector<8x128xbf16>
      %c0_13 = arith.constant 0 : index
      %c0_14 = arith.constant 0 : index
      %24 = vector.load %arg8[%c0_13, %c0_14] : memref<128x1024xbf16, #tpu.memory_space<vmem>>, vector<128x1024xbf16>
      %cst_15 = arith.constant dense<0.000000e+00> : vector<8x1024xf32>
      %25 = tpu.matmul %23, %24, %cst_15 {dimension_numbers = #tpu.dot_dimension_numbers<[1], [0], [0], [1], [0, 0, 1, 1], [], []>} : vector<8x128xbf16>, vector<128x1024xbf16>, vector<8x1024xf32> -> vector<8x1024xf32>
      %c1 = arith.constant 1 : index
      %c0_16 = arith.constant 0 : index
      %26 = vector.load %arg11[%c1, %c0_16] : memref<4x1024xf32, #tpu.memory_space<vmem>>, vector<1x1024xf32>
      %27 = vector.shape_cast %26 : vector<1x1024xf32> to vector<1024xf32>
      %28 = vector.shape_cast %27 : vector<1024xf32> to vector<1x1024xf32>
      %29 = vector.broadcast %28 : vector<1x1024xf32> to vector<8x1024xf32>
      %30 = arith.addf %25, %29 : vector<8x1024xf32>
      %cst_17 = arith.constant 0.000000e+00 : f32
      %31 = vector.broadcast %cst_17 : f32 to vector<8x1024xf32>
      %32 = arith.maximumf %30, %31 : vector<8x1024xf32>
      %33 = arith.truncf %32 : vector<8x1024xf32> to vector<8x1024xbf16>
      %c0_18 = arith.constant 0 : index
      %c0_19 = arith.constant 0 : index
      %34 = vector.load %arg9[%c0_18, %c0_19] : memref<1024x256xbf16, #tpu.memory_space<vmem>>, vector<1024x256xbf16>
      %cst_20 = arith.constant dense<0.000000e+00> : vector<8x256xf32>
      %35 = tpu.matmul %33, %34, %cst_20 {dimension_numbers = #tpu.dot_dimension_numbers<[1], [0], [0], [1], [0, 0, 1, 1], [], []>} : vector<8x1024xbf16>, vector<1024x256xbf16>, vector<8x256xf32> -> vector<8x256xf32>
      %c2 = arith.constant 2 : index
      %c0_21 = arith.constant 0 : index
      %36 = vector.load %arg11[%c2, %c0_21] : memref<4x1024xf32, #tpu.memory_space<vmem>>, vector<1x256xf32>
      %37 = vector.shape_cast %36 : vector<1x256xf32> to vector<256xf32>
      %38 = vector.shape_cast %37 : vector<256xf32> to vector<1x256xf32>
      %39 = vector.broadcast %38 : vector<1x256xf32> to vector<8x256xf32>
      %40 = arith.addf %35, %39 : vector<8x256xf32>
      %cst_22 = arith.constant 0.000000e+00 : f32
      %41 = vector.broadcast %cst_22 : f32 to vector<8x256xf32>
      %42 = arith.maximumf %40, %41 : vector<8x256xf32>
      %43 = arith.truncf %42 : vector<8x256xf32> to vector<8x256xbf16>
      %c0_23 = arith.constant 0 : index
      %c0_24 = arith.constant 0 : index
      %44 = vector.load %arg10[%c0_23, %c0_24] : memref<256x128xbf16, #tpu.memory_space<vmem>>, vector<256x128xbf16>
      %cst_25 = arith.constant dense<0.000000e+00> : vector<8x128xf32>
      %45 = tpu.matmul %43, %44, %cst_25 {dimension_numbers = #tpu.dot_dimension_numbers<[1], [0], [0], [1], [0, 0, 1, 1], [], []>} : vector<8x256xbf16>, vector<256x128xbf16>, vector<8x128xf32> -> vector<8x128xf32>
      %c3 = arith.constant 3 : index
      %c0_26 = arith.constant 0 : index
      %46 = vector.load %arg11[%c3, %c0_26] : memref<4x1024xf32, #tpu.memory_space<vmem>>, vector<1x128xf32>
      %47 = vector.shape_cast %46 : vector<1x128xf32> to vector<128xf32>
      %48 = vector.shape_cast %47 : vector<128xf32> to vector<1x128xf32>
      %49 = vector.broadcast %48 : vector<1x128xf32> to vector<8x128xf32>
      %50 = arith.addf %45, %49 : vector<8x128xf32>
      %c0_27 = arith.constant 0 : index
      %c0_28 = arith.constant 0 : index
      %51 = vector.load %arg12[%c0_27, %c0_28] : memref<8x128xf32, #tpu.memory_space<vmem>>, vector<8x128xf32>
      tpu.vector_store %arg12[%c0_27, %c0_28], %50 {strides = array<i32>} : memref<8x128xf32, #tpu.memory_space<vmem>>, vector<8x128xf32>,
    } else {
    }
    return
  }
  func.func @transform_0(%arg0: i32) -> (i32, i32) {
    %c0_i32 = arith.constant 0 : i32
    %c0_i32_0 = arith.constant 0 : i32
    %c0_i32_1 = arith.constant 0 : i32
    return %c0_i32, %c0_i32_0 : i32, i32
  }
  func.func @transform_1(%arg0: i32) -> (i32, i32) {
    %c0_i32 = arith.constant 0 : i32
    %c0_i32_0 = arith.constant 0 : i32
    %c0_i32_1 = arith.constant 0 : i32
    return %c0_i32, %c0_i32_0 : i32, i32
  }
  func.func @transform_2(%arg0: i32) -> (i32, i32, i32) {
    %c5_i32 = arith.constant 5 : i32
    %0 = arith.minsi %arg0, %c5_i32 : i32
    %c0_i32 = arith.constant 0 : i32
    %c0_i32_0 = arith.constant 0 : i32
    %c0_i32_1 = arith.constant 0 : i32
    return %0, %c0_i32, %c0_i32_0 : i32, i32, i32
  }
  func.func @transform_3(%arg0: i32) -> (i32, i32, i32) {
    %c5_i32 = arith.constant 5 : i32
    %0 = arith.minsi %arg0, %c5_i32 : i32
    %c0_i32 = arith.constant 0 : i32
    %c0_i32_0 = arith.constant 0 : i32
    %c0_i32_1 = arith.constant 0 : i32
    return %0, %c0_i32, %c0_i32_0 : i32, i32, i32
  }
  func.func @transform_4(%arg0: i32) -> (i32, i32, i32) {
    %c5_i32 = arith.constant 5 : i32
    %0 = arith.minsi %arg0, %c5_i32 : i32
    %c0_i32 = arith.constant 0 : i32
    %c0_i32_0 = arith.constant 0 : i32
    %c0_i32_1 = arith.constant 0 : i32
    return %0, %c0_i32, %c0_i32_0 : i32, i32, i32
  }
  func.func @transform_5(%arg0: i32) -> (i32, i32) {
    %c0_i32 = arith.constant 0 : i32
    %c0_i32_0 = arith.constant 0 : i32
    %c0_i32_1 = arith.constant 0 : i32
    return %c0_i32, %c0_i32_0 : i32, i32
  }
  func.func @transform_6(%arg0: i32) -> (i32, i32) {
    %c0_i32 = arith.constant 0 : i32
    %c0_i32_0 = arith.constant 0 : i32
    %c0_i32_1 = arith.constant 0 : i32
    return %c0_i32, %c0_i32_0 : i32, i32
  }
  func.func @transform_7(%arg0: i32) -> (i32, i32) {
    %c0_i32 = arith.constant 0 : i32
    %c0_i32_0 = arith.constant 0 : i32
    %c0_i32_1 = arith.constant 0 : i32
    return %c0_i32, %c0_i32_0 : i32, i32
  }
  func.func @transform_8(%arg0: i32) -> (i32, i32) {
    %c0_i32 = arith.constant 0 : i32
    %c0_i32_0 = arith.constant 0 : i32
    %c0_i32_1 = arith.constant 0 : i32
    return %c0_i32, %c0_i32_0 : i32, i32
  }
  func.func @transform_9(%arg0: i32) -> (i32, i32) {
    %c0_i32 = arith.constant 0 : i32
    %c0_i32_0 = arith.constant 0 : i32
    %c0_i32_1 = arith.constant 0 : i32
    return %c0_i32, %c0_i32_0 : i32, i32
  }
  func.func @transform_10(%arg0: i32) -> (i32, i32) {
    %c0_i32 = arith.constant 0 : i32
    %c0_i32_0 = arith.constant 0 : i32
    %c0_i32_1 = arith.constant 0 : i32
    return %c0_i32, %c0_i32_0 : i32, i32
  }
  func.func @transform_11(%arg0: i32) -> (i32, i32) {
    %c0_i32 = arith.constant 0 : i32
    %c0_i32_0 = arith.constant 0 : i32
    %c0_i32_1 = arith.constant 0 : i32
    return %c0_i32, %c0_i32_0 : i32, i32
  }
}

</mosaic_0001>

<bundles_post_ra>
// kernel: molecular_graph_network.1
= control target key start
LH: loop header
LB: loop body
LE: loop exit
PB: predicated region body
PF: predicated region fallthrough
CT: control target
= control target key end

     0   :  { %s4500_s17 = smov 0   ;;  %s5677_s0 = inlined_call_operand.vmem [shape: bf16[128,128], index: 0, kind: input, shape index: {}]   ;;  %s5678_s1 = inlined_call_operand.vmem [shape: bf16[128,256], index: 1, kind: input, shape index: {}]   ;;  %s5679_s2 = inlined_call_operand.vmem [shape: bf16[6,256,256], index: 2, kind: input, shape index: {}]   ;;  %s5680_s3 = inlined_call_operand.vmem [shape: bf16[6,256,256], index: 3, kind: input, shape index: {}]   ;;  %s5681_s4 = inlined_call_operand.vmem [shape: f32[6,4,256], index: 4, kind: input, shape index: {}]   ;;  %s5682_s5 = inlined_call_operand.vmem [shape: bf16[8,128], index: 5, kind: input, shape index: {}]   ;;  %s5683_s6 = inlined_call_operand.vmem [shape: bf16[256,128], index: 6, kind: input, shape index: {}]   ;;  %s5684_s7 = inlined_call_operand.vmem [shape: bf16[128,1024], index: 7, kind: input, shape index: {}]   ;;  %s5685_s8 = inlined_call_operand.vmem [shape: bf16[1024,256], index: 8, kind: input, shape index: {}]   ;;  %s5686_s9 = inlined_call_operand.vmem [shape: bf16[256,128], index: 9, kind: input, shape index: {}]   ;;  %s5687_s10 = inlined_call_operand.vmem [shape: f32[4,1024], index: 10, kind: input, shape index: {}]   ;;  %s5688_s11 = inlined_call_operand.vmem [shape: f32[8,128], index: 11, kind: output, shape index: {}]  }
   0x1 LB: > { %s4506_s18 = sadd.s32 4294967295, %s4436_s17   ;;  %p3677_p0 = scmp.ge.s32.totalorder %s4436_s17, 1  ;;  %s4436_s17 = sphi %s4500_s17, %s21_s17  }
   0x2   : > { %p376_p1 = scmp.lt.s32.totalorder %s4436_s17, 8 }
   0x4   : > { %p377_p2 = pnand %p3677_p0, %p376_p1 }
   0x5   : > { %p427_p3 = scmp.lt.s32.totalorder (!%p377_p2), %s4506_s18, 5  ;;  %p3693_p4 = scmp.ne.s32.totalorder (!%p377_p2), %s4506_s18, 0 }
   0x6   : > { %380 = sbr.rel (%p377_p2) target bundleno = 2051 (0x803), region = 64 }
   0xd   : > { %s428_s19 = scalar_select %p427_p3, %s4506_s18, 5 }
   0xe   : > { %458 = sbr.rel (%p3693_p4) target bundleno = 33 (0x21), region = 68  ;;  %v459_v0 = vld [vmem:[%s5678_s1] sm:$0xff] (!%p3693_p4)  ;;  %v460_v1 = vld [vmem:[%s5678_s1 + $0x8] sm:$0xff] (!%p3693_p4)  ;;  %v461_v2 = vld [vmem:[%s5678_s1 + $0x10] sm:$0xff] (!%p3693_p4) }
   0xf   : > { %s5690_s19 = smov (!%p427_p3, %s428_s19), 5  ;;  %v475_v3 = vunpack.c.l.bf16 (!%p3693_p4), %v459_v0  ;;  %v476_v4 = vunpack.c.h.bf16 (!%p3693_p4), %v459_v0  ;;  %v477_v5 = vunpack.c.l.bf16 (!%p3693_p4), %v460_v1  ;;  %v478_v6 = vunpack.c.h.bf16 (!%p3693_p4), %v460_v1  ;;  %v462_v7 = vld [vmem:[%s5678_s1 + $0x18] sm:$0xff] (!%p3693_p4)  ;;  %v463_v8 = vld [vmem:[%s5678_s1 + $0x20] sm:$0xff] (!%p3693_p4)  ;;  %v464_v9 = vld [vmem:[%s5678_s1 + $0x28] sm:$0xff] (!%p3693_p4) }
  0x10   : > { %s4001_s20 = sshll.u32 %s5690_s19, 8  ;;  %s4003_s21 = sshll.u32 %s5690_s19, 3  ;;  %v479_v10 = vunpack.c.l.bf16 (!%p3693_p4), %v461_v2  ;;  %v480_v11 = vunpack.c.h.bf16 (!%p3693_p4), %v461_v2  ;;  %v481_v12 = vunpack.c.l.bf16 (!%p3693_p4), %v462_v7  ;;  %v482_v13 = vunpack.c.h.bf16 (!%p3693_p4), %v462_v7  ;;  %v465_v14 = vld [vmem:[%s5678_s1 + $0x30] sm:$0xff] (!%p3693_p4)  ;;  %v466_v15 = vld [vmem:[%s5678_s1 + $0x38] sm:$0xff] (!%p3693_p4)  ;;  %v467_v16 = vld [vmem:[%s5678_s1 + $0x40] sm:$0xff] (!%p3693_p4) }
  0x11   : > { %s4515_s24 = scalar_lea.vmem %s5679_s2, %s4001_s20  ;;  %s4520_s27 = scalar_lea.vmem %s5680_s3, %s4001_s20  ;;  %507 = vst [vmem:[#allocation2] sm:$0xff] (!%p3693_p4), %v475_v3  ;;  %508 = vst [vmem:[#allocation2 + $0x8] sm:$0xff] (!%p3693_p4), %v476_v4  ;;  %v483_v17 = vunpack.c.l.bf16 (!%p3693_p4), %v463_v8  ;;  %v484_v18 = vunpack.c.h.bf16 (!%p3693_p4), %v463_v8  ;;  %v485_v19 = vunpack.c.l.bf16 (!%p3693_p4), %v464_v9  ;;  %v486_v20 = vunpack.c.h.bf16 (!%p3693_p4), %v464_v9  ;;  %v468_v21 = vld [vmem:[%s5678_s1 + $0x48] sm:$0xff] (!%p3693_p4)  ;;  %v469_v22 = vld [vmem:[%s5678_s1 + $0x50] sm:$0xff] (!%p3693_p4) }
  0x12   : > { %s4525_s30 = scalar_lea.vmem %s5681_s4, %s4003_s21  ;;  %509 = vst [vmem:[#allocation2 + $0x10] sm:$0xff] (!%p3693_p4), %v477_v5  ;;  %510 = vst [vmem:[#allocation2 + $0x18] sm:$0xff] (!%p3693_p4), %v478_v6  ;;  %v470_v23 = vld [vmem:[%s5678_s1 + $0x58] sm:$0xff] (!%p3693_p4)  ;;  %v487_v24 = vunpack.c.l.bf16 (!%p3693_p4), %v465_v14  ;;  %v488_v25 = vunpack.c.h.bf16 (!%p3693_p4), %v465_v14  ;;  %v489_v26 = vunpack.c.l.bf16 (!%p3693_p4), %v466_v15  ;;  %v490_v27 = vunpack.c.h.bf16 (!%p3693_p4), %v466_v15  ;;  %v471_v28 = vld [vmem:[%s5678_s1 + $0x60] sm:$0xff] (!%p3693_p4) }
  0x13   : > { %511 = vst [vmem:[#allocation2 + $0x20] sm:$0xff] (!%p3693_p4), %v479_v10  ;;  %512 = vst [vmem:[#allocation2 + $0x28] sm:$0xff] (!%p3693_p4), %v480_v11  ;;  %v472_v29 = vld [vmem:[%s5678_s1 + $0x68] sm:$0xff] (!%p3693_p4)  ;;  %v491_v30 = vunpack.c.l.bf16 (!%p3693_p4), %v467_v16  ;;  %v492_v31 = vunpack.c.h.bf16 (!%p3693_p4), %v467_v16  ;;  %v493_v32 = vunpack.c.l.bf16 (!%p3693_p4), %v468_v21  ;;  %v494_v33 = vunpack.c.h.bf16 (!%p3693_p4), %v468_v21  ;;  %v473_v34 = vld [vmem:[%s5678_s1 + $0x70] sm:$0xff] (!%p3693_p4) }
  0x14   : > { %513 = vst [vmem:[#allocation2 + $0x30] sm:$0xff] (!%p3693_p4), %v481_v12  ;;  %514 = vst [vmem:[#allocation2 + $0x38] sm:$0xff] (!%p3693_p4), %v482_v13  ;;  %v474_v35 = vld [vmem:[%s5678_s1 + $0x78] sm:$0xff] (!%p3693_p4)  ;;  %v495_v36 = vunpack.c.l.bf16 (!%p3693_p4), %v469_v22  ;;  %v496_v37 = vunpack.c.h.bf16 (!%p3693_p4), %v469_v22  ;;  %v497_v38 = vunpack.c.l.bf16 (!%p3693_p4), %v470_v23  ;;  %v498_v39 = vunpack.c.h.bf16 (!%p3693_p4), %v470_v23 }
  0x15   : > { %515 = vst [vmem:[#allocation2 + $0x40] sm:$0xff] %v483_v17  ;;  %516 = vst [vmem:[#allocation2 + $0x48] sm:$0xff] %v484_v18  ;;  %v499_v40 = vunpack.c.l.bf16 %v471_v28  ;;  %v500_v41 = vunpack.c.h.bf16 %v471_v28  ;;  %v501_v42 = vunpack.c.l.bf16 %v472_v29  ;;  %v502_v43 = vunpack.c.h.bf16 %v472_v29 }
  0x16   : > { %517 = vst [vmem:[#allocation2 + $0x50] sm:$0xff] %v485_v19  ;;  %518 = vst [vmem:[#allocation2 + $0x58] sm:$0xff] %v486_v20  ;;  %v503_v44 = vunpack.c.l.bf16 %v473_v34  ;;  %v504_v45 = vunpack.c.h.bf16 %v473_v34  ;;  %v505_v46 = vunpack.c.l.bf16 %v474_v35  ;;  %v506_v47 = vunpack.c.h.bf16 %v474_v35 }
  0x17   : > { %519 = vst [vmem:[#allocation2 + $0x60] sm:$0xff] %v487_v24  ;;  %520 = vst [vmem:[#allocation2 + $0x68] sm:$0xff] %v488_v25 }
  0x18   : > { %521 = vst [vmem:[#allocation2 + $0x70] sm:$0xff] %v489_v26  ;;  %522 = vst [vmem:[#allocation2 + $0x78] sm:$0xff] %v490_v27 }
  0x19   : > { %523 = vst [vmem:[#allocation2 + $0x80] sm:$0xff] %v491_v30  ;;  %524 = vst [vmem:[#allocation2 + $0x88] sm:$0xff] %v492_v31 }
  0x1a   : > { %525 = vst [vmem:[#allocation2 + $0x90] sm:$0xff] %v493_v32  ;;  %526 = vst [vmem:[#allocation2 + $0x98] sm:$0xff] %v494_v33 }
  0x1b   : > { %527 = vst [vmem:[#allocation2 + $0xa0] sm:$0xff] %v495_v36  ;;  %528 = vst [vmem:[#allocation2 + $0xa8] sm:$0xff] %v496_v37 }
  0x1c   : > { %529 = vst [vmem:[#allocation2 + $0xb0] sm:$0xff] %v497_v38  ;;  %530 = vst [vmem:[#allocation2 + $0xb8] sm:$0xff] %v498_v39 }
  0x1d   : > { %531 = vst [vmem:[#allocation2 + $0xc0] sm:$0xff] %v499_v40  ;;  %532 = vst [vmem:[#allocation2 + $0xc8] sm:$0xff] %v500_v41 }
  0x1e   : > { %533 = vst [vmem:[#allocation2 + $0xd0] sm:$0xff] %v501_v42  ;;  %534 = vst [vmem:[#allocation2 + $0xd8] sm:$0xff] %v502_v43 }
  0x1f   : > { %535 = vst [vmem:[#allocation2 + $0xe0] sm:$0xff] %v503_v44  ;;  %536 = vst [vmem:[#allocation2 + $0xe8] sm:$0xff] %v504_v45 }
  0x20   : > { %537 = vst [vmem:[#allocation2 + $0xf0] sm:$0xff] %v505_v46  ;;  %538 = vst [vmem:[#allocation2 + $0xf8] sm:$0xff] %v506_v47 }
  0x21 PF: > { %p3694_p5 = scmp.ge.s32.totalorder %s4506_s18, 6 }
  0x22   : > { %v4438_v55 = vmov (!%p3694_p5), 0   ;;  %v554_v61 = vld [vmem:[#allocation2 + $0x58] sm:$0xff] (!%p3694_p5)  ;;  %v553_v1 = vld [vmem:[#allocation2 + $0x50] sm:$0xff] (!%p3694_p5)  ;;  %v556_v2 = vld [vmem:[#allocation2 + $0x68] sm:$0xff] (!%p3694_p5) }
  0x23   : > { %542 = sbr.rel (%p3694_p5) target bundleno = 792 (0x318), region = 72  ;;  %687 = vmatprep.mubr.bf16.mxu0 (!%p3694_p5), %v4438_v55  ;;  %v558_v3 = vld [vmem:[#allocation2 + $0x78] sm:$0xff] (!%p3694_p5)  ;;  %v555_v6 = vld [vmem:[#allocation2 + $0x60] sm:$0xff] (!%p3694_p5)  ;;  %v557_v7 = vld [vmem:[#allocation2 + $0x70] sm:$0xff] (!%p3694_p5) }
  0x24   : > { %v544_v48 = vld [vmem:[#allocation2 + $0x8] sm:$0xff] (!%p3694_p5)  ;;  %v543_v50 = vld [vmem:[#allocation2] sm:$0xff] (!%p3694_p5)  ;;  %v582_v5 = vpack.c.bf16 (!%p3694_p5), %v558_v3, %v556_v2  ;;  %v562_v9 = vld [vmem:[#allocation2 + $0x98] sm:$0xff] (!%p3694_p5)  ;;  %v581_v11 = vpack.c.bf16 (!%p3694_p5), %v557_v7, %v555_v6 }
  0x25   : > { %v546_v49 = vld [vmem:[#allocation2 + $0x18] sm:$0xff] (!%p3694_p5)  ;;  %v545_v52 = vld [vmem:[#allocation2 + $0x10] sm:$0xff] (!%p3694_p5)  ;;  %v560_v8 = vld [vmem:[#allocation2 + $0x88] sm:$0xff] (!%p3694_p5) }
  0x26   : > { %v576_v51 = vpack.c.bf16 (!%p3694_p5), %v546_v49, %v544_v48  ;;  %v548_v53 = vld [vmem:[#allocation2 + $0x28] sm:$0xff] (!%p3694_p5)  ;;  %v575_v56 = vpack.c.bf16 (!%p3694_p5), %v545_v52, %v543_v50  ;;  %v547_v58 = vld [vmem:[#allocation2 + $0x20] sm:$0xff] (!%p3694_p5)  ;;  %v561_v12 = vld [vmem:[#allocation2 + $0x90] sm:$0xff] (!%p3694_p5)  ;;  %v584_v13 = vpack.c.bf16 (!%p3694_p5), %v562_v9, %v560_v8 }
  0x27   : > { %v550_v54 = vld [vmem:[#allocation2 + $0x38] sm:$0xff] (!%p3694_p5)  ;;  %v549_v59 = vld [vmem:[#allocation2 + $0x30] sm:$0xff] (!%p3694_p5)  ;;  %v559_v10 = vld [vmem:[#allocation2 + $0x80] sm:$0xff] (!%p3694_p5) }
  0x28   : > { %v578_v57 = vpack.c.bf16 (!%p3694_p5), %v550_v54, %v548_v53  ;;  %v552_v60 = vld [vmem:[#allocation2 + $0x48] sm:$0xff] (!%p3694_p5)  ;;  %655 = vmatprep.subr.bf16.mxu0 (!%p3694_p5), %v576_v51  ;;  %v577_v62 = vpack.c.bf16 (!%p3694_p5), %v549_v59, %v547_v58  ;;  %v551_v0 = vld [vmem:[#allocation2 + $0x40] sm:$0xff] (!%p3694_p5)  ;;  %v566_v15 = vld [vmem:[#allocation2 + $0xb8] sm:$0xff] (!%p3694_p5)  ;;  %v583_v17 = vpack.c.bf16 (!%p3694_p5), %v561_v12, %v559_v10 }
  0x29   : > { %656 = vmatpush1.bf16.msra.mxu0 (!%p3694_p5), %v575_v56  ;;  %v580_v63 = vpack.c.bf16 (!%p3694_p5), %v554_v61, %v552_v60  ;;  %v579_v4 = vpack.c.bf16 (!%p3694_p5), %v553_v1, %v551_v0  ;;  %v564_v14 = vld [vmem:[#allocation2 + $0xa8] sm:$0xff] (!%p3694_p5)  ;;  %v563_v16 = vld [vmem:[#allocation2 + $0xa0] sm:$0xff] (!%p3694_p5)  ;;  %v565_v18 = vld [vmem:[#allocation2 + $0xb0] sm:$0xff] (!%p3694_p5) }
  0x2a   : > { %657 = vmatprep.subr.bf16.mxu0 %v578_v57  ;;  %v586_v19 = vpack.c.bf16 %v566_v15, %v564_v14  ;;  %v568_v20 = vld [vmem:[#allocation2 + $0xc8] sm:$0xff]  ;;  %v570_v21 = vld [vmem:[#allocation2 + $0xd8] sm:$0xff]  ;;  %v567_v22 = vld [vmem:[#allocation2 + $0xc0] sm:$0xff]  ;;  %v585_v26 = vpack.c.bf16 %v565_v18, %v563_v16 }
  0x2b   : > { %v569_v23 = vld [vmem:[#allocation2 + $0xd0] sm:$0xff]  ;;  %v4110_v24 = vld [vmem:[%s4515_s24 + $0x4] ss:$8 sps:$4 sm:$0xff]   ;;  %v4112_v25 = vld [vmem:[%s4515_s24] ss:$8 sps:$4 sm:$0xff]   ;;  %v588_v28 = vpack.c.bf16 %v570_v21, %v568_v20 }
  0x2c   : > { %v4113_v27 = vld [vmem:[%s4515_s24 + $0x14] ss:$8 sps:$4 sm:$0xff]   ;;  %v572_v29 = vld [vmem:[#allocation2 + $0xe8] sm:$0xff]  ;;  %988 = vmatprep.subr.bf16.mxu1 %v4110_v24  ;;  %v4115_v31 = vld [vmem:[%s4515_s24 + $0x10] ss:$8 sps:$4 sm:$0xff]   ;;  %v587_v33 = vpack.c.bf16 %v569_v23, %v567_v22 }
  0x2d   : > { %658 = vmatpush1.bf16.msra.mxu0 %v577_v62  ;;  %v574_v30 = vld [vmem:[#allocation2 + $0xf8] sm:$0xff]  ;;  %989 = vmatpush1.bf16.msra.mxu1 %v4112_v25  ;;  %v4116_v32 = vld [vmem:[%s4515_s24 + $0x24] ss:$8 sps:$4 sm:$0xff]   ;;  %v573_v36 = vld [vmem:[#allocation2 + $0xf0] sm:$0xff] }
  0x2e   : > { %659 = vmatprep.subr.bf16.mxu0 %v580_v63  ;;  %990 = vmatprep.subr.bf16.mxu1 %v4113_v27  ;;  %v571_v34 = vld [vmem:[#allocation2 + $0xe0] sm:$0xff]  ;;  %v590_v35 = vpack.c.bf16 %v574_v30, %v572_v29  ;;  %v4119_v38 = vld [vmem:[%s4515_s24 + $0x34] ss:$8 sps:$4 sm:$0xff]   ;;  %v4121_v40 = vld [vmem:[%s4515_s24 + $0x30] ss:$8 sps:$4 sm:$0xff]  }
  0x2f   : > { %v4118_v37 = vld [vmem:[%s4515_s24 + $0x20] ss:$8 sps:$4 sm:$0xff]   ;;  %v589_v39 = vpack.c.bf16 %v573_v36, %v571_v34  ;;  %v4122_v42 = vld [vmem:[%s4515_s24 + $0x44] ss:$8 sps:$4 sm:$0xff]   ;;  %v4125_v44 = vld [vmem:[%s4515_s24 + $0x54] ss:$8 sps:$4 sm:$0xff]  }
  0x30   : > { %v4102_v41 = vld [vmem:[%s5677_s0] sm:$0xff]   ;;  %v4103_v45 = vld [vmem:[%s5677_s0 + $0x8] sm:$0xff]   ;;  %v4127_v46 = vld [vmem:[%s4515_s24 + $0x50] ss:$8 sps:$4 sm:$0xff]  }
  0x31   : > { %660 = vmatpush1.bf16.msra.mxu0 %v579_v4  ;;  %991 = vmatpush1.bf16.msra.mxu1 %v4115_v31  ;;  %v4124_v43 = vld [vmem:[%s4515_s24 + $0x40] ss:$8 sps:$4 sm:$0xff]   ;;  %v4128_v47 = vld [vmem:[%s4515_s24 + $0x64] ss:$8 sps:$4 sm:$0xff]   ;;  %v4131_v49 = vld [vmem:[%s4515_s24 + $0x74] ss:$8 sps:$4 sm:$0xff]  }
  0x32   : > { %661 = vmatprep.subr.bf16.mxu0 %v582_v5  ;;  %992 = vmatprep.subr.bf16.mxu1 %v4116_v32  ;;  %v4130_v48 = vld [vmem:[%s4515_s24 + $0x60] ss:$8 sps:$4 sm:$0xff]   ;;  %v4133_v50 = vld [vmem:[%s4515_s24 + $0x70] ss:$8 sps:$4 sm:$0xff]   ;;  %v4134_v52 = vld [vmem:[%s4515_s24 + $0x84] ss:$8 sps:$4 sm:$0xff]  }
  0x33   : > { %v4104_v51 = vld [vmem:[%s5677_s0 + $0x10] sm:$0xff]   ;;  %v4136_v53 = vld [vmem:[%s4515_s24 + $0x80] ss:$8 sps:$4 sm:$0xff]   ;;  %v4105_v57 = vld [vmem:[%s5677_s0 + $0x18] sm:$0xff]  }
  0x34   : > { %v4137_v54 = vld [vmem:[%s4515_s24 + $0x94] ss:$8 sps:$4 sm:$0xff]   ;;  %v4139_v56 = vld [vmem:[%s4515_s24 + $0x90] ss:$8 sps:$4 sm:$0xff]   ;;  %v4140_v58 = vld [vmem:[%s4515_s24 + $0xa4] ss:$8 sps:$4 sm:$0xff]  }
  0x35   : > { %662 = vmatpush1.bf16.msra.mxu0 %v581_v11  ;;  %993 = vmatpush1.bf16.msra.mxu1 %v4118_v37  ;;  %v4142_v59 = vld [vmem:[%s4515_s24 + $0xa0] ss:$8 sps:$4 sm:$0xff]   ;;  %v4143_v60 = vld [vmem:[%s4515_s24 + $0xb4] ss:$8 sps:$4 sm:$0xff]   ;;  %v4145_v61 = vld [vmem:[%s4515_s24 + $0xb0] ss:$8 sps:$4 sm:$0xff]  }
  0x36   : > { %663 = vmatprep.subr.bf16.mxu0 %v584_v13  ;;  %994 = vmatprep.subr.bf16.mxu1 %v4119_v38  ;;  %v4106_v62 = vld [vmem:[%s5677_s0 + $0x20] sm:$0xff]   ;;  %v4149_v1 = vld [vmem:[%s4515_s24 + $0xd4] ss:$8 sps:$4 sm:$0xff]   ;;  %v4151_v2 = vld [vmem:[%s4515_s24 + $0xd0] ss:$8 sps:$4 sm:$0xff]  }
  0x37   : > { %v4146_v63 = vld [vmem:[%s4515_s24 + $0xc4] ss:$8 sps:$4 sm:$0xff]   ;;  %v4148_v0 = vld [vmem:[%s4515_s24 + $0xc0] ss:$8 sps:$4 sm:$0xff]   ;;  %v4108_v5 = vld [vmem:[%s5677_s0 + $0x30] sm:$0xff]  }
  0x38   : > { %v4107_v3 = vld [vmem:[%s5677_s0 + $0x28] sm:$0xff]   ;;  %v4109_v6 = vld [vmem:[%s5677_s0 + $0x38] sm:$0xff]  }
  0x39   : > { %664 = vmatpush1.bf16.msra.mxu0 %v583_v17  ;;  %995 = vmatpush1.bf16.msra.mxu1 %v4121_v40  ;;  %v4152_v4 = vld [vmem:[%s4515_s24 + $0xe4] ss:$8 sps:$4 sm:$0xff]   ;;  %v4154_v7 = vld [vmem:[%s4515_s24 + $0xe0] ss:$8 sps:$4 sm:$0xff]   ;;  %v4155_v8 = vld [vmem:[%s4515_s24 + $0xf4] ss:$8 sps:$4 sm:$0xff]  }
  0x3a   : > { %665 = vmatprep.subr.bf16.mxu0 %v586_v19  ;;  %996 = vmatprep.subr.bf16.mxu1 %v4122_v42  ;;  %v4157_v9 = vld [vmem:[%s4515_s24 + $0xf0] ss:$8 sps:$4 sm:$0xff]   ;;  %v4642_v10 = vld [vmem:[%s4520_s27] ss:$8 sps:$4 sm:$0xff]   ;;  %v4160_v11 = vld [vmem:[%s4520_s27 + $0x4] ss:$8 sps:$4 sm:$0xff]  }
  0x3b   : > { %v4650_v12 = vld [vmem:[%s4520_s27 + $0x10] ss:$8 sps:$4 sm:$0xff]   ;;  %v4654_v13 = vld [vmem:[%s4520_s27 + $0x24] ss:$8 sps:$4 sm:$0xff]   ;;  %v4658_v14 = vld [vmem:[%s4520_s27 + $0x20] ss:$8 sps:$4 sm:$0xff]  }
  0x3c   : > { %v4662_v15 = vld [vmem:[%s4520_s27 + $0x34] ss:$8 sps:$4 sm:$0xff]   ;;  %v4666_v16 = vld [vmem:[%s4520_s27 + $0x30] ss:$8 sps:$4 sm:$0xff]   ;;  %v4670_v17 = vld [vmem:[%s4520_s27 + $0x44] ss:$8 sps:$4 sm:$0xff]  }
  0x3d   : > { %666 = vmatpush1.bf16.msra.mxu0 %v585_v26  ;;  %997 = vmatpush1.bf16.msra.mxu1 %v4124_v43  ;;  %v4674_v18 = vld [vmem:[%s4520_s27 + $0x40] ss:$8 sps:$4 sm:$0xff]   ;;  %v4678_v19 = vld [vmem:[%s4520_s27 + $0x54] ss:$8 sps:$4 sm:$0xff]   ;;  %v4682_v20 = vld [vmem:[%s4520_s27 + $0x50] ss:$8 sps:$4 sm:$0xff]  }
  0x3e   : > { %667 = vmatprep.subr.bf16.mxu0 %v588_v28  ;;  %998 = vmatprep.subr.bf16.mxu1 %v4125_v44  ;;  %v4686_v21 = vld [vmem:[%s4520_s27 + $0x64] ss:$8 sps:$4 sm:$0xff]   ;;  %v4690_v22 = vld [vmem:[%s4520_s27 + $0x60] ss:$8 sps:$4 sm:$0xff]   ;;  %v4694_v23 = vld [vmem:[%s4520_s27 + $0x74] ss:$8 sps:$4 sm:$0xff]  }
  0x3f   : > { %v4698_v24 = vld [vmem:[%s4520_s27 + $0x70] ss:$8 sps:$4 sm:$0xff]   ;;  %v4702_v25 = vld [vmem:[%s4520_s27 + $0x84] ss:$8 sps:$4 sm:$0xff]   ;;  %v4706_v26 = vld [vmem:[%s4520_s27 + $0x80] ss:$8 sps:$4 sm:$0xff]  }
  0x40   : > { %v4710_v27 = vld [vmem:[%s4520_s27 + $0x94] ss:$8 sps:$4 sm:$0xff]   ;;  %v4714_v28 = vld [vmem:[%s4520_s27 + $0x90] ss:$8 sps:$4 sm:$0xff]   ;;  %v4718_v29 = vld [vmem:[%s4520_s27 + $0xa4] ss:$8 sps:$4 sm:$0xff]  }
  0x41   : > { %668 = vmatpush1.bf16.msra.mxu0 %v587_v33  ;;  %999 = vmatpush1.bf16.msra.mxu1 %v4127_v46  ;;  %v4722_v30 = vld [vmem:[%s4520_s27 + $0xa0] ss:$8 sps:$4 sm:$0xff]   ;;  %v4726_v31 = vld [vmem:[%s4520_s27 + $0xb4] ss:$8 sps:$4 sm:$0xff]   ;;  %v4730_v32 = vld [vmem:[%s4520_s27 + $0xb0] ss:$8 sps:$4 sm:$0xff]  }
  0x42   : > { %669 = vmatprep.subr.bf16.mxu0 %v590_v35  ;;  %1000 = vmatprep.subr.bf16.mxu1 %v4128_v47  ;;  %v4734_v33 = vld [vmem:[%s4520_s27 + $0xc4] ss:$8 sps:$4 sm:$0xff]   ;;  %v4738_v34 = vld [vmem:[%s4520_s27 + $0xc0] ss:$8 sps:$4 sm:$0xff]   ;;  %v4742_v35 = vld [vmem:[%s4520_s27 + $0xd4] ss:$8 sps:$4 sm:$0xff]  }
  0x43   : > { %v4746_v36 = vld [vmem:[%s4520_s27 + $0xd0] ss:$8 sps:$4 sm:$0xff]  }
  0x45   : > { %670 = vmatpush1.bf16.msra.mxu0 %v589_v39  ;;  %1001 = vmatpush1.bf16.msra.mxu1 %v4130_v48 }
  0x46   : > { %1002 = vmatprep.subr.bf16.mxu1 %v4131_v49  ;;  %1354 = vmatprep.subr.bf16.mxu0 %v4160_v11 }
  0x48   : > { %688 = vmatmul.mubr.bf16.vlgmr.msra.gmra.mrb[0].mxu0 %v4102_v41 }
  0x49   : > { %697 = vmatprep.mubr.bf16.mxu0 %v4438_v55  ;;  %1003 = vmatpush1.bf16.msra.mxu1 %v4133_v50 }
  0x4a   : > { %1004 = vmatprep.subr.bf16.mxu1 %v4134_v52  ;;  %1355 = vmatpush1.bf16.msra.mxu0 %v4642_v10 }
  0x4d   : > { %1005 = vmatpush1.bf16.msra.mxu1 %v4136_v53 }
  0x4e   : > { %1006 = vmatprep.subr.bf16.mxu1 %v4137_v54 }
  0x50   : > { %698 = vmatmul.mubr.bf16.gmra.mrb[4].mxu0 %v4103_v45 }
  0x51   : > { %707 = vmatprep.mubr.bf16.mxu0 %v4438_v55  ;;  %1007 = vmatpush1.bf16.msra.mxu1 %v4139_v56 }
  0x52   : > { %1008 = vmatprep.subr.bf16.mxu1 %v4140_v58 }
  0x55   : > { %1009 = vmatpush1.bf16.msra.mxu1 %v4142_v59 }
  0x56   : > { %1010 = vmatprep.subr.bf16.mxu1 %v4143_v60 }
  0x58   : > { %708 = vmatmul.mubr.bf16.gmra.mrb[8].mxu0 %v4104_v51 }
  0x59   : > { %717 = vmatprep.mubr.bf16.mxu0 %v4438_v55  ;;  %1011 = vmatpush1.bf16.msra.mxu1 %v4145_v61 }
  0x5a   : > { %1012 = vmatprep.subr.bf16.mxu1 %v4146_v63 }
  0x5d   : > { %1013 = vmatpush1.bf16.msra.mxu1 %v4148_v0 }
  0x5e   : > { %1014 = vmatprep.subr.bf16.mxu1 %v4149_v1 }
  0x60   : > { %718 = vmatmul.mubr.bf16.gmra.mrb[12].mxu0 %v4105_v57 }
  0x61   : > { %727 = vmatprep.mubr.bf16.mxu0 %v4438_v55  ;;  %1015 = vmatpush1.bf16.msra.mxu1 %v4151_v2 }
  0x62   : > { %1016 = vmatprep.subr.bf16.mxu1 %v4152_v4 }
  0x65   : > { %1017 = vmatpush1.bf16.msra.mxu1 %v4154_v7 }
  0x66   : > { %1018 = vmatprep.subr.bf16.mxu1 %v4155_v8 }
  0x68   : > { %728 = vmatmul.mubr.bf16.gmra.mrb[16].mxu0 %v4106_v62 }
  0x69   : > { %737 = vmatprep.mubr.bf16.mxu0 %v4438_v55  ;;  %1019 = vmatpush1.bf16.msra.mxu1 %v4157_v9 }
  0x6a   : > { %4048 = vmatprep.subr.bf16.mxu1 %v4160_v11 }
  0x70   : > { %738 = vmatmul.mubr.bf16.gmra.mrb[20].mxu0 %v4107_v3 }
  0x71   : > { %747 = vmatprep.mubr.bf16.mxu0 %v4438_v55 }
  0x78   : > { %748 = vmatmul.mubr.bf16.gmra.mrb[24].mxu0 %v4108_v5 }
  0x79   : > { %757 = vmatprep.mubr.bf16.mxu0 %v4438_v55  ;;  %v4646_v55 = vld [vmem:[%s4520_s27 + $0x14] ss:$8 sps:$4 sm:$0xff]  }
  0x7a   : > { %1356 = vmatprep.subr.bf16.mxu0 %v4646_v55 }
  0x7b   : > { %1357 = vmatpush1.bf16.msra.mxu0 %v4650_v12 }
  0x7c   : > { %1358 = vmatprep.subr.bf16.mxu0 %v4654_v13 }
  0x7f   : > { %1359 = vmatpush1.bf16.msra.mxu0 %v4658_v14 }
  0x80   : > { %758 = vmatmul.mubr.bf16.gmra.mrb[28].mxu0 %v4109_v6  ;;  %1360 = vmatprep.subr.bf16.mxu0 %v4662_v15 }
  0x83   : > { %1361 = vmatpush1.bf16.msra.mxu0 %v4666_v16 }
  0x84   : > { %1362 = vmatprep.subr.bf16.mxu0 %v4670_v17 }
  0x87   : > { %1363 = vmatpush1.bf16.msra.mxu0 %v4674_v18 }
  0x88   : > { %1364 = vmatprep.subr.bf16.mxu0 %v4678_v19 }
  0x8b   : > { %1365 = vmatpush1.bf16.msra.mxu0 %v4682_v20 }
  0x8c   : > { %1366 = vmatprep.subr.bf16.mxu0 %v4686_v21 }
  0x8f   : > { %1367 = vmatpush1.bf16.msra.mxu0 %v4690_v22 }
  0x90   : > { %1368 = vmatprep.subr.bf16.mxu0 %v4694_v23 }
  0x93   : > { %1369 = vmatpush1.bf16.msra.mxu0 %v4698_v24 }
  0x94   : > { %1370 = vmatprep.subr.bf16.mxu0 %v4702_v25 }
  0x97   : > { %1371 = vmatpush1.bf16.msra.mxu0 %v4706_v26 }
  0x98   : > { %1372 = vmatprep.subr.bf16.mxu0 %v4710_v27 }
  0x9b   : > { %1373 = vmatpush1.bf16.msra.mxu0 %v4714_v28 }
  0x9c   : > { %1374 = vmatprep.subr.bf16.mxu0 %v4718_v29 }
  0x9f   : > { %1375 = vmatpush1.bf16.msra.mxu0 %v4722_v30 }
  0xa0   : > { %1376 = vmatprep.subr.bf16.mxu0 %v4726_v31 }
  0xa3   : > { %1377 = vmatpush1.bf16.msra.mxu0 %v4730_v32 }
  0xa4   : > { %1378 = vmatprep.subr.bf16.mxu0 %v4734_v33 }
  0xa7   : > { %1379 = vmatpush1.bf16.msra.mxu0 %v4738_v34 }
  0xa8   : > { %1380 = vmatprep.subr.bf16.mxu0 %v4742_v35 }
  0xab   : > { %1381 = vmatpush1.bf16.msra.mxu0 %v4746_v36 }
 0x11b   : > { %v689_v37 = vpop.f32.mrb[0].mxu0 }
 0x11c   : > { %v691_v38 = vpop.f32.mrb[1].mxu0 }
 0x11d   : > { %v693_v39 = vpop.f32.mrb[2].mxu0 }
 0x11e   : > { %v768_v40 = vpack.c.bf16 %v693_v39, %v689_v37  ;;  %v695_v41 = vpop.f32.mrb[3].mxu0 }
 0x11f   : > { %v769_v42 = vpack.c.bf16 %v695_v41, %v691_v38 }
 0x121   : > { %1020 = vmatprep.mubr.bf16.mxu1 %v769_v42 }
 0x122   : > { %1021 = vmatmul.mubr.bf16.vlgmr.msra.gmra.mrb[0].mxu1 %v768_v40 }
 0x123   : > { %v699_v43 = vpop.f32.mrb[4].mxu0  ;;  %4064 = vmatpush1.bf16.msra.mxu1 %v4642_v10 }
 0x124   : > { %v701_v44 = vpop.f32.mrb[5].mxu0  ;;  %4049 = vmatprep.subr.bf16.mxu1 %v4646_v55 }
 0x125   : > { %v703_v45 = vpop.f32.mrb[6].mxu0 }
 0x126   : > { %v770_v46 = vpack.c.bf16 %v703_v45, %v699_v43  ;;  %v705_v47 = vpop.f32.mrb[7].mxu0 }
 0x127   : > { %v771_v48 = vpack.c.bf16 %v705_v47, %v701_v44  ;;  %4065 = vmatpush1.bf16.msra.mxu1 %v4650_v12 }
 0x128   : > { %4050 = vmatprep.subr.bf16.mxu1 %v4654_v13 }
 0x129   : > { %1030 = vmatprep.mubr.bf16.mxu1 %v771_v48 }
 0x12a   : > { %1031 = vmatmul.mubr.bf16.gmra.mrb[4].mxu1 %v770_v46 }
 0x12b   : > { %v709_v49 = vpop.f32.mrb[8].mxu0  ;;  %4066 = vmatpush1.bf16.msra.mxu1 %v4658_v14 }
 0x12c   : > { %v711_v50 = vpop.f32.mrb[9].mxu0  ;;  %4051 = vmatprep.subr.bf16.mxu1 %v4662_v15 }
 0x12d   : > { %v713_v51 = vpop.f32.mrb[10].mxu0 }
 0x12e   : > { %v772_v52 = vpack.c.bf16 %v713_v51, %v709_v49  ;;  %v715_v53 = vpop.f32.mrb[11].mxu0 }
 0x12f   : > { %v773_v54 = vpack.c.bf16 %v715_v53, %v711_v50  ;;  %4067 = vmatpush1.bf16.msra.mxu1 %v4666_v16 }
 0x130   : > { %4052 = vmatprep.subr.bf16.mxu1 %v4670_v17 }
 0x131   : > { %1040 = vmatprep.mubr.bf16.mxu1 %v773_v54 }
 0x132   : > { %1041 = vmatmul.mubr.bf16.gmra.mrb[8].mxu1 %v772_v52 }
 0x133   : > { %v719_v56 = vpop.f32.mrb[12].mxu0  ;;  %4068 = vmatpush1.bf16.msra.mxu1 %v4674_v18 }
 0x134   : > { %v721_v57 = vpop.f32.mrb[13].mxu0  ;;  %4053 = vmatprep.subr.bf16.mxu1 %v4678_v19 }
 0x135   : > { %v723_v58 = vpop.f32.mrb[14].mxu0 }
 0x136   : > { %v774_v59 = vpack.c.bf16 %v723_v58, %v719_v56  ;;  %v725_v60 = vpop.f32.mrb[15].mxu0 }
 0x137   : > { %v775_v61 = vpack.c.bf16 %v725_v60, %v721_v57  ;;  %4069 = vmatpush1.bf16.msra.mxu1 %v4682_v20 }
 0x138   : > { %4054 = vmatprep.subr.bf16.mxu1 %v4686_v21  ;;  %v4202_v21 = vld [vmem:[%s4520_s27 + $0xe4] ss:$8 sps:$4 sm:$0xff]  }
 0x139   : > { %1050 = vmatprep.mubr.bf16.mxu1 %v775_v61  ;;  %1382 = vmatprep.subr.bf16.mxu0 %v4202_v21 }
 0x13a   : > { %1051 = vmatmul.mubr.bf16.gmra.mrb[12].mxu1 %v774_v59 }
 0x13b   : > { %v729_v62 = vpop.f32.mrb[16].mxu0  ;;  %4070 = vmatpush1.bf16.msra.mxu1 %v4690_v22  ;;  %v4200_v22 = vld [vmem:[%s4520_s27 + $0xe0] ss:$8 sps:$4 sm:$0xff]  }
 0x13c   : > { %v731_v63 = vpop.f32.mrb[17].mxu0  ;;  %4055 = vmatprep.subr.bf16.mxu1 %v4694_v23  ;;  %1383 = vmatpush1.bf16.msra.mxu0 %v4200_v22  ;;  %v4205_v23 = vld [vmem:[%s4520_s27 + $0xf4] ss:$8 sps:$4 sm:$0xff]  }
 0x13d   : > { %v733_v0 = vpop.f32.mrb[18].mxu0  ;;  %1384 = vmatprep.subr.bf16.mxu0 %v4205_v23 }
 0x13e   : > { %v776_v1 = vpack.c.bf16 %v733_v0, %v729_v62  ;;  %v735_v2 = vpop.f32.mrb[19].mxu0 }
 0x13f   : > { %v777_v3 = vpack.c.bf16 %v735_v2, %v731_v63  ;;  %4071 = vmatpush1.bf16.msra.mxu1 %v4698_v24  ;;  %v4203_v24 = vld [vmem:[%s4520_s27 + $0xf0] ss:$8 sps:$4 sm:$0xff]  }
 0x140   : > { %4056 = vmatprep.subr.bf16.mxu1 %v4702_v25  ;;  %1385 = vmatpush1.bf16.msra.mxu0 %v4203_v24  ;;  %v818_v25 = vlaneseq }
 0x141   : > { %1060 = vmatprep.mubr.bf16.mxu1 %v777_v3 }
 0x142   : > { %1061 = vmatmul.mubr.bf16.gmra.mrb[16].mxu1 %v776_v1 }
 0x143   : > { %v739_v4 = vpop.f32.mrb[20].mxu0  ;;  %4072 = vmatpush1.bf16.msra.mxu1 %v4706_v26  ;;  %v819_v26 = vshrl.u32 %v818_v25, 7 }
 0x144   : > { %v741_v5 = vpop.f32.mrb[21].mxu0  ;;  %4057 = vmatprep.subr.bf16.mxu1 %v4710_v27 }
 0x145   : > { %v743_v6 = vpop.f32.mrb[22].mxu0  ;;  %v4781_v27 = vsub.s32 0, %v819_v26 }
 0x146   : > { %v778_v7 = vpack.c.bf16 %v743_v6, %v739_v4  ;;  %v745_v8 = vpop.f32.mrb[23].mxu0 }
 0x147   : > { %v779_v9 = vpack.c.bf16 %v745_v8, %v741_v5  ;;  %4073 = vmatpush1.bf16.msra.mxu1 %v4714_v28  ;;  %v816_v28 = vld [vmem:[%s4525_s30] ss:$4 sm:$0x3] }
 0x148   : > { %4058 = vmatprep.subr.bf16.mxu1 %v4718_v29  ;;  %v4784_v29 = vsub.s32 1, %v819_v26 }
 0x149   : > { %1070 = vmatprep.mubr.bf16.mxu1 %v779_v9 }
 0x14a   : > { %1071 = vmatmul.mubr.bf16.gmra.mrb[20].mxu1 %v778_v7 }
 0x14b   : > { %v749_v10 = vpop.f32.mrb[24].mxu0  ;;  %4074 = vmatpush1.bf16.msra.mxu1 %v4722_v30  ;;  %v4787_v30 = vrot.slane %v816_v28, %v4781_v27 }
 0x14c   : > { %v751_v11 = vpop.f32.mrb[25].mxu0  ;;  %4059 = vmatprep.subr.bf16.mxu1 %v4726_v31  ;;  %v4790_v31 = vrot.slane %v816_v28, %v4784_v29 }
 0x14d   : > { %v753_v55 = vpop.f32.mrb[26].mxu0 }
 0x14e   : > { %v780_v12 = vpack.c.bf16 %v753_v55, %v749_v10  ;;  %v755_v13 = vpop.f32.mrb[27].mxu0 }
 0x14f   : > { %v781_v14 = vpack.c.bf16 %v755_v13, %v751_v11  ;;  %4075 = vmatpush1.bf16.msra.mxu1 %v4730_v32 }
 0x150   : > { %4060 = vmatprep.subr.bf16.mxu1 %v4734_v33 }
 0x151   : > { %1080 = vmatprep.mubr.bf16.mxu1 %v781_v14 }
 0x152   : > { %1081 = vmatmul.mubr.bf16.gmra.mrb[24].mxu1 %v780_v12 }
 0x153   : > { %v759_v15 = vpop.f32.mrb[28].mxu0  ;;  %4076 = vmatpush1.bf16.msra.mxu1 %v4738_v34 }
 0x154   : > { %v761_v16 = vpop.f32.mrb[29].mxu0  ;;  %4061 = vmatprep.subr.bf16.mxu1 %v4742_v35 }
 0x155   : > { %v763_v17 = vpop.f32.mrb[30].mxu0 }
 0x156   : > { %v782_v18 = vpack.c.bf16 %v763_v17, %v759_v15  ;;  %v765_v19 = vpop.f32.mrb[31].mxu0 }
 0x157   : > { %v783_v20 = vpack.c.bf16 %v765_v19, %v761_v16  ;;  %4077 = vmatpush1.bf16.msra.mxu1 %v4746_v36 }
 0x158   : > { %4062 = vmatprep.subr.bf16.mxu1 %v4202_v21 }
 0x159   : > { %1090 = vmatprep.mubr.bf16.mxu1 %v783_v20 }
 0x15a   : > { %1091 = vmatmul.mubr.bf16.gmra.mrb[28].mxu1 %v782_v18 }
 0x15b   : > { %4078 = vmatpush1.bf16.msra.mxu1 %v4200_v22 }
 0x15c   : > { %4063 = vmatprep.subr.bf16.mxu1 %v4205_v23 }
 0x15f   : > { %4079 = vmatpush1.bf16.msra.mxu1 %v4203_v24 }
 0x1f5   : > { %v1022_v32 = vpop.f32.mrb[0].mxu1 }
 0x1f6   : > { %v1023_v33 = vadd.f32 %v1022_v32, %v4787_v30  ;;  %v1024_v34 = vpop.f32.mrb[1].mxu1 }
 0x1f7   : > { %v1025_v35 = vadd.f32 %v1024_v34, %v4790_v31  ;;  %v1026_v36 = vpop.f32.mrb[2].mxu1 }
 0x1f8   : > { %v1027_v37 = vadd.f32 %v1026_v36, %v4787_v30  ;;  %v1028_v38 = vpop.f32.mrb[3].mxu1  ;;  %v1101_v40 = vmax.f32 %v1023_v33, 0.0 }
 0x1f9   : > { %v1029_v39 = vadd.f32 %v1028_v38, %v4790_v31  ;;  %v1102_v42 = vmax.f32 %v1025_v35, 0.0 }
 0x1fa   : > { %v1103_v41 = vmax.f32 %v1027_v37, 0.0 }
 0x1fb   : > { %v1104_v43 = vmax.f32 %v1029_v39, 0.0 }
 0x1fc   : > { %v1133_v44 = vpack.c.bf16 %v1103_v41, %v1101_v40 }
 0x1fd   : > { %v1134_v45 = vpack.c.bf16 %v1104_v43, %v1102_v42  ;;  %v1032_v46 = vpop.f32.mrb[4].mxu1 }
 0x1fe   : > { %v1033_v47 = vadd.f32 %v1032_v46, %v4787_v30  ;;  %v1034_v48 = vpop.f32.mrb[5].mxu1 }
 0x1ff   : > { %v1035_v49 = vadd.f32 %v1034_v48, %v4790_v31  ;;  %v1036_v50 = vpop.f32.mrb[6].mxu1  ;;  %1386 = vmatprep.mubr.bf16.mxu0 %v1134_v45 }
 0x200   : > { %v1037_v51 = vadd.f32 %v1036_v50, %v4787_v30  ;;  %v1038_v52 = vpop.f32.mrb[7].mxu1  ;;  %1387 = vmatmul.mubr.bf16.vlgmr.msra.gmra.mrb[32].mxu0 %v1133_v44  ;;  %v1105_v54 = vmax.f32 %v1033_v47, 0.0 }
 0x201   : > { %v1039_v53 = vadd.f32 %v1038_v52, %v4790_v31  ;;  %v1106_v57 = vmax.f32 %v1035_v49, 0.0 }
 0x202   : > { %v1107_v56 = vmax.f32 %v1037_v51, 0.0 }
 0x203   : > { %v1108_v58 = vmax.f32 %v1039_v53, 0.0 }
 0x204   : > { %v1135_v59 = vpack.c.bf16 %v1107_v56, %v1105_v54 }
 0x205   : > { %v1136_v60 = vpack.c.bf16 %v1108_v58, %v1106_v57  ;;  %v1042_v61 = vpop.f32.mrb[8].mxu1 }
 0x206   : > { %v1043_v62 = vadd.f32 %v1042_v61, %v4787_v30  ;;  %v1044_v63 = vpop.f32.mrb[9].mxu1 }
 0x207   : > { %v1045_v0 = vadd.f32 %v1044_v63, %v4790_v31  ;;  %v1046_v1 = vpop.f32.mrb[10].mxu1  ;;  %1396 = vmatprep.mubr.bf16.mxu0 %v1136_v60 }
 0x208   : > { %v1047_v2 = vadd.f32 %v1046_v1, %v4787_v30  ;;  %v1048_v3 = vpop.f32.mrb[11].mxu1  ;;  %1397 = vmatmul.mubr.bf16.gmra.mrb[36].mxu0 %v1135_v59  ;;  %v1109_v5 = vmax.f32 %v1043_v62, 0.0 }
 0x209   : > { %v1049_v4 = vadd.f32 %v1048_v3, %v4790_v31  ;;  %v1110_v7 = vmax.f32 %v1045_v0, 0.0 }
 0x20a   : > { %v1111_v6 = vmax.f32 %v1047_v2, 0.0 }
 0x20b   : > { %v1112_v8 = vmax.f32 %v1049_v4, 0.0 }
 0x20c   : > { %v1137_v9 = vpack.c.bf16 %v1111_v6, %v1109_v5 }
 0x20d   : > { %v1138_v10 = vpack.c.bf16 %v1112_v8, %v1110_v7  ;;  %v1052_v11 = vpop.f32.mrb[12].mxu1 }
 0x20e   : > { %v1053_v55 = vadd.f32 %v1052_v11, %v4787_v30  ;;  %v1054_v12 = vpop.f32.mrb[13].mxu1 }
 0x20f   : > { %v1055_v13 = vadd.f32 %v1054_v12, %v4790_v31  ;;  %v1056_v14 = vpop.f32.mrb[14].mxu1  ;;  %1406 = vmatprep.mubr.bf16.mxu0 %v1138_v10 }
 0x210   : > { %v1057_v15 = vadd.f32 %v1056_v14, %v4787_v30  ;;  %v1058_v16 = vpop.f32.mrb[15].mxu1  ;;  %1407 = vmatmul.mubr.bf16.gmra.mrb[40].mxu0 %v1137_v9  ;;  %v1113_v18 = vmax.f32 %v1053_v55, 0.0 }
 0x211   : > { %v1059_v17 = vadd.f32 %v1058_v16, %v4790_v31  ;;  %v1114_v20 = vmax.f32 %v1055_v13, 0.0 }
 0x212   : > { %v1115_v19 = vmax.f32 %v1057_v15, 0.0 }
 0x213   : > { %v1116_v21 = vmax.f32 %v1059_v17, 0.0 }
 0x214   : > { %v1139_v22 = vpack.c.bf16 %v1115_v19, %v1113_v18 }
 0x215   : > { %v1140_v23 = vpack.c.bf16 %v1116_v21, %v1114_v20  ;;  %v1062_v24 = vpop.f32.mrb[16].mxu1  ;;  %v3735_v20 = vld [vmem:[%s4525_s30 + $0x1] ss:$4 sm:$0x3] }
 0x216   : > { %v1063_v25 = vadd.f32 %v1062_v24, %v4787_v30  ;;  %v1064_v26 = vpop.f32.mrb[17].mxu1  ;;  %v4826_v21 = vrot.slane %v3735_v20, %v4781_v27  ;;  %v3769_v24 = vld [vmem:[%s4525_s30 + $0x3] ss:$4 sm:$0x3] }
 0x217   : > { %v1065_v28 = vadd.f32 %v1064_v26, %v4790_v31  ;;  %v1066_v32 = vpop.f32.mrb[18].mxu1  ;;  %1416 = vmatprep.mubr.bf16.mxu0 %v1140_v23 }
 0x218   : > { %v1067_v33 = vadd.f32 %v1066_v32, %v4787_v30  ;;  %v1068_v34 = vpop.f32.mrb[19].mxu1  ;;  %1417 = vmatmul.mubr.bf16.gmra.mrb[44].mxu0 %v1139_v22  ;;  %v1117_v36 = vmax.f32 %v1063_v25, 0.0  ;;  %v3768_v22 = vld [vmem:[%s4525_s30 + $0x2] ss:$4 sm:$0x3] }
 0x219   : > { %v1069_v35 = vadd.f32 %v1068_v34, %v4790_v31  ;;  %v1118_v38 = vmax.f32 %v1065_v28, 0.0  ;;  %v4835_v25 = vrot.slane %v3768_v22, %v4781_v27  ;;  %v4839_v32 = vrot.slane %v3768_v22, %v4784_v29 }
 0x21a   : > { %v1119_v37 = vmax.f32 %v1067_v33, 0.0 }
 0x21b   : > { %v1120_v39 = vmax.f32 %v1069_v35, 0.0  ;;  %v4842_v35 = vrot.slane %v3769_v24, %v4781_v27 }
 0x21c   : > { %v1141_v40 = vpack.c.bf16 %v1119_v37, %v1117_v36 }
 0x21d   : > { %v1142_v41 = vpack.c.bf16 %v1120_v39, %v1118_v38  ;;  %v1072_v42 = vpop.f32.mrb[20].mxu1  ;;  %v4846_v39 = vrot.slane %v3769_v24, %v4784_v29 }
 0x21e   : > { %v1073_v43 = vadd.f32 %v1072_v42, %v4787_v30  ;;  %v1074_v44 = vpop.f32.mrb[21].mxu1 }
 0x21f   : > { %v1075_v45 = vadd.f32 %v1074_v44, %v4790_v31  ;;  %v1076_v46 = vpop.f32.mrb[22].mxu1  ;;  %1426 = vmatprep.mubr.bf16.mxu0 %v1142_v41 }
 0x220   : > { %v1077_v47 = vadd.f32 %v1076_v46, %v4787_v30  ;;  %v1078_v48 = vpop.f32.mrb[23].mxu1  ;;  %1427 = vmatmul.mubr.bf16.gmra.mrb[48].mxu0 %v1141_v40  ;;  %v1121_v50 = vmax.f32 %v1073_v43, 0.0 }
 0x221   : > { %v1079_v49 = vadd.f32 %v1078_v48, %v4790_v31  ;;  %v1122_v52 = vmax.f32 %v1075_v45, 0.0 }
 0x222   : > { %v1123_v51 = vmax.f32 %v1077_v47, 0.0 }
 0x223   : > { %v1124_v53 = vmax.f32 %v1079_v49, 0.0 }
 0x224   : > { %v1143_v54 = vpack.c.bf16 %v1123_v51, %v1121_v50 }
 0x225   : > { %v1144_v56 = vpack.c.bf16 %v1124_v53, %v1122_v52  ;;  %v1082_v57 = vpop.f32.mrb[24].mxu1 }
 0x226   : > { %v1083_v58 = vadd.f32 %v1082_v57, %v4787_v30  ;;  %v1084_v59 = vpop.f32.mrb[25].mxu1 }
 0x227   : > { %v1085_v60 = vadd.f32 %v1084_v59, %v4790_v31  ;;  %v1086_v61 = vpop.f32.mrb[26].mxu1  ;;  %1436 = vmatprep.mubr.bf16.mxu0 %v1144_v56 }
 0x228   : > { %v1087_v62 = vadd.f32 %v1086_v61, %v4787_v30  ;;  %v1088_v63 = vpop.f32.mrb[27].mxu1  ;;  %1437 = vmatmul.mubr.bf16.gmra.mrb[52].mxu0 %v1143_v54  ;;  %v1125_v1 = vmax.f32 %v1083_v58, 0.0 }
 0x229   : > { %v1089_v0 = vadd.f32 %v1088_v63, %v4790_v31  ;;  %v1126_v3 = vmax.f32 %v1085_v60, 0.0 }
 0x22a   : > { %v1127_v2 = vmax.f32 %v1087_v62, 0.0 }
 0x22b   : > { %v1128_v4 = vmax.f32 %v1089_v0, 0.0 }
 0x22c   : > { %v1145_v5 = vpack.c.bf16 %v1127_v2, %v1125_v1 }
 0x22d   : > { %v1146_v6 = vpack.c.bf16 %v1128_v4, %v1126_v3  ;;  %v1092_v7 = vpop.f32.mrb[28].mxu1 }
 0x22e   : > { %v1093_v8 = vadd.f32 %v1092_v7, %v4787_v30  ;;  %v1094_v9 = vpop.f32.mrb[29].mxu1 }
 0x22f   : > { %v1095_v10 = vadd.f32 %v1094_v9, %v4790_v31  ;;  %v1096_v11 = vpop.f32.mrb[30].mxu1  ;;  %1446 = vmatprep.mubr.bf16.mxu1 %v1146_v6 }
 0x230   : > { %v1097_v55 = vadd.f32 %v1096_v11, %v4787_v30  ;;  %v1098_v12 = vpop.f32.mrb[31].mxu1  ;;  %1447 = vmatmul.mubr.bf16.vlgmr.msra.gmra.mrb[32].mxu1 %v1145_v5  ;;  %v1129_v14 = vmax.f32 %v1093_v8, 0.0  ;;  %v4830_v30 = vrot.slane %v3735_v20, %v4784_v29 }
 0x231   : > { %v1099_v13 = vadd.f32 %v1098_v12, %v4790_v31  ;;  %v1130_v16 = vmax.f32 %v1095_v10, 0.0 }
 0x232   : > { %v1131_v15 = vmax.f32 %v1097_v55, 0.0 }
 0x233   : > { %v1132_v17 = vmax.f32 %v1099_v13, 0.0 }
 0x234   : > { %v1147_v18 = vpack.c.bf16 %v1131_v15, %v1129_v14 }
 0x235   : > { %v1148_v19 = vpack.c.bf16 %v1132_v17, %v1130_v16 }
 0x237   : > { %1456 = vmatprep.mubr.bf16.mxu1 %v1148_v19 }
 0x238   : > { %1457 = vmatmul.mubr.bf16.gmra.mrb[36].mxu1 %v1147_v18 }
 0x2d3   : > { %v1388_v23 = vpop.f32.mrb[32].mxu0 }
 0x2d4   : > { %v1389_v31 = vadd.f32 %v1388_v23, %v4826_v21  ;;  %v1390_v26 = vpop.f32.mrb[33].mxu0 }
 0x2d5   : > { %v1391_v28 = vadd.f32 %v1390_v26, %v4830_v30  ;;  %v1392_v33 = vpop.f32.mrb[34].mxu0 }
 0x2d6   : > { %v1467_v34 = vmax.f32 %v1389_v31, 0.0  ;;  %v1393_v36 = vadd.f32 %v1392_v33, %v4826_v21  ;;  %v1394_v37 = vpop.f32.mrb[35].mxu0 }
 0x2d7   : > { %v1468_v38 = vmax.f32 %v1391_v28, 0.0  ;;  %v1395_v40 = vadd.f32 %v1394_v37, %v4830_v30 }
 0x2d8   : > { %v1512_v41 = vmul.f32 %v4835_v25, %v1467_v34  ;;  %v1469_v42 = vmax.f32 %v1393_v36, 0.0 }
 0x2d9   : > { %v1513_v43 = vmul.f32 %v4839_v32, %v1468_v38  ;;  %v1470_v44 = vmax.f32 %v1395_v40, 0.0 }
 0x2da   : > { %v1557_v45 = vadd.f32 %v4842_v35, %v1512_v41  ;;  %v1514_v27 = vmul.f32 %v4835_v25, %v1469_v42 }
 0x2db   : > { %v1558_v46 = vadd.f32 %v4846_v39, %v1513_v43  ;;  %v1515_v47 = vmul.f32 %v4839_v32, %v1470_v44  ;;  %v1398_v48 = vpop.f32.mrb[36].mxu0 }
 0x2dc   : > { %1589 = vst [vmem:[#allocation2] sm:$0xff] %v1557_v45  ;;  %v1559_v29 = vadd.f32 %v4842_v35, %v1514_v27  ;;  %v1399_v49 = vadd.f32 %v1398_v48, %v4826_v21  ;;  %v1400_v50 = vpop.f32.mrb[37].mxu0 }
 0x2dd   : > { %1590 = vst [vmem:[#allocation2 + $0x8] sm:$0xff] %v1558_v46  ;;  %v1560_v51 = vadd.f32 %v4846_v39, %v1515_v47  ;;  %v1401_v52 = vadd.f32 %v1400_v50, %v4830_v30  ;;  %v1402_v53 = vpop.f32.mrb[38].mxu0 }
 0x2de   : > { %1591 = vst [vmem:[#allocation2 + $0x10] sm:$0xff] %v1559_v29  ;;  %v1471_v54 = vmax.f32 %v1399_v49, 0.0  ;;  %v1403_v56 = vadd.f32 %v1402_v53, %v4826_v21  ;;  %v1404_v57 = vpop.f32.mrb[39].mxu0 }
 0x2df   : > { %1592 = vst [vmem:[#allocation2 + $0x18] sm:$0xff] %v1560_v51  ;;  %v1472_v58 = vmax.f32 %v1401_v52, 0.0  ;;  %v1405_v59 = vadd.f32 %v1404_v57, %v4830_v30 }
 0x2e0   : > { %v1516_v60 = vmul.f32 %v4835_v25, %v1471_v54  ;;  %v1473_v61 = vmax.f32 %v1403_v56, 0.0 }
 0x2e1   : > { %v1517_v62 = vmul.f32 %v4839_v32, %v1472_v58  ;;  %v1474_v63 = vmax.f32 %v1405_v59, 0.0 }
 0x2e2   : > { %v1561_v0 = vadd.f32 %v4842_v35, %v1516_v60  ;;  %v1518_v1 = vmul.f32 %v4835_v25, %v1473_v61 }
 0x2e3   : > { %v1562_v2 = vadd.f32 %v4846_v39, %v1517_v62  ;;  %v1519_v3 = vmul.f32 %v4839_v32, %v1474_v63  ;;  %v1408_v4 = vpop.f32.mrb[40].mxu0 }
 0x2e4   : > { %1593 = vst [vmem:[#allocation2 + $0x20] sm:$0xff] %v1561_v0  ;;  %v1563_v5 = vadd.f32 %v4842_v35, %v1518_v1  ;;  %v1409_v6 = vadd.f32 %v1408_v4, %v4826_v21  ;;  %v1410_v7 = vpop.f32.mrb[41].mxu0 }
 0x2e5   : > { %1594 = vst [vmem:[#allocation2 + $0x28] sm:$0xff] %v1562_v2  ;;  %v1564_v8 = vadd.f32 %v4846_v39, %v1519_v3  ;;  %v1411_v9 = vadd.f32 %v1410_v7, %v4830_v30  ;;  %v1412_v10 = vpop.f32.mrb[42].mxu0 }
 0x2e6   : > { %1595 = vst [vmem:[#allocation2 + $0x30] sm:$0xff] %v1563_v5  ;;  %v1475_v11 = vmax.f32 %v1409_v6, 0.0  ;;  %v1413_v55 = vadd.f32 %v1412_v10, %v4826_v21  ;;  %v1414_v12 = vpop.f32.mrb[43].mxu0 }
 0x2e7   : > { %1596 = vst [vmem:[#allocation2 + $0x38] sm:$0xff] %v1564_v8  ;;  %v1476_v13 = vmax.f32 %v1411_v9, 0.0  ;;  %v1415_v14 = vadd.f32 %v1414_v12, %v4830_v30 }
 0x2e8   : > { %v1520_v15 = vmul.f32 %v4835_v25, %v1475_v11  ;;  %v1477_v16 = vmax.f32 %v1413_v55, 0.0 }
 0x2e9   : > { %v1521_v17 = vmul.f32 %v4839_v32, %v1476_v13  ;;  %v1478_v18 = vmax.f32 %v1415_v14, 0.0 }
 0x2ea   : > { %v1565_v19 = vadd.f32 %v4842_v35, %v1520_v15  ;;  %v1522_v20 = vmul.f32 %v4835_v25, %v1477_v16 }
 0x2eb   : > { %v1566_v22 = vadd.f32 %v4846_v39, %v1521_v17  ;;  %v1523_v23 = vmul.f32 %v4839_v32, %v1478_v18  ;;  %v1418_v24 = vpop.f32.mrb[44].mxu0 }
 0x2ec   : > { %1597 = vst [vmem:[#allocation2 + $0x40] sm:$0xff] %v1565_v19  ;;  %v1567_v31 = vadd.f32 %v4842_v35, %v1522_v20  ;;  %v1419_v26 = vadd.f32 %v1418_v24, %v4826_v21  ;;  %v1420_v28 = vpop.f32.mrb[45].mxu0 }
 0x2ed   : > { %1598 = vst [vmem:[#allocation2 + $0x48] sm:$0xff] %v1566_v22  ;;  %v1568_v33 = vadd.f32 %v4846_v39, %v1523_v23  ;;  %v1421_v34 = vadd.f32 %v1420_v28, %v4830_v30  ;;  %v1422_v36 = vpop.f32.mrb[46].mxu0 }
 0x2ee   : > { %1599 = vst [vmem:[#allocation2 + $0x50] sm:$0xff] %v1567_v31  ;;  %v1479_v37 = vmax.f32 %v1419_v26, 0.0  ;;  %v1423_v38 = vadd.f32 %v1422_v36, %v4826_v21  ;;  %v1424_v40 = vpop.f32.mrb[47].mxu0 }
 0x2ef   : > { %1600 = vst [vmem:[#allocation2 + $0x58] sm:$0xff] %v1568_v33  ;;  %v1480_v41 = vmax.f32 %v1421_v34, 0.0  ;;  %v1425_v42 = vadd.f32 %v1424_v40, %v4830_v30 }
 0x2f0   : > { %v1524_v43 = vmul.f32 %v4835_v25, %v1479_v37  ;;  %v1481_v44 = vmax.f32 %v1423_v38, 0.0 }
 0x2f1   : > { %v1525_v45 = vmul.f32 %v4839_v32, %v1480_v41  ;;  %v1482_v27 = vmax.f32 %v1425_v42, 0.0 }
 0x2f2   : > { %v1569_v46 = vadd.f32 %v4842_v35, %v1524_v43  ;;  %v1526_v47 = vmul.f32 %v4835_v25, %v1481_v44 }
 0x2f3   : > { %v1570_v48 = vadd.f32 %v4846_v39, %v1525_v45  ;;  %v1527_v29 = vmul.f32 %v4839_v32, %v1482_v27  ;;  %v1428_v49 = vpop.f32.mrb[48].mxu0 }
 0x2f4   : > { %1601 = vst [vmem:[#allocation2 + $0x60] sm:$0xff] %v1569_v46  ;;  %v1571_v50 = vadd.f32 %v4842_v35, %v1526_v47  ;;  %v1429_v51 = vadd.f32 %v1428_v49, %v4826_v21  ;;  %v1430_v52 = vpop.f32.mrb[49].mxu0 }
 0x2f5   : > { %1602 = vst [vmem:[#allocation2 + $0x68] sm:$0xff] %v1570_v48  ;;  %v1572_v53 = vadd.f32 %v4846_v39, %v1527_v29  ;;  %v1431_v54 = vadd.f32 %v1430_v52, %v4830_v30  ;;  %v1432_v56 = vpop.f32.mrb[50].mxu0 }
 0x2f6   : > { %1603 = vst [vmem:[#allocation2 + $0x70] sm:$0xff] %v1571_v50  ;;  %v1483_v57 = vmax.f32 %v1429_v51, 0.0  ;;  %v1433_v58 = vadd.f32 %v1432_v56, %v4826_v21  ;;  %v1434_v59 = vpop.f32.mrb[51].mxu0 }
 0x2f7   : > { %1604 = vst [vmem:[#allocation2 + $0x78] sm:$0xff] %v1572_v53  ;;  %v1484_v60 = vmax.f32 %v1431_v54, 0.0  ;;  %v1435_v61 = vadd.f32 %v1434_v59, %v4830_v30 }
 0x2f8   : > { %v1528_v62 = vmul.f32 %v4835_v25, %v1483_v57  ;;  %v1485_v63 = vmax.f32 %v1433_v58, 0.0 }
 0x2f9   : > { %v1529_v0 = vmul.f32 %v4839_v32, %v1484_v60  ;;  %v1486_v1 = vmax.f32 %v1435_v61, 0.0 }
 0x2fa   : > { %v1573_v2 = vadd.f32 %v4842_v35, %v1528_v62  ;;  %v1530_v3 = vmul.f32 %v4835_v25, %v1485_v63 }
 0x2fb   : > { %v1574_v4 = vadd.f32 %v4846_v39, %v1529_v0  ;;  %v1531_v5 = vmul.f32 %v4839_v32, %v1486_v1  ;;  %v1438_v6 = vpop.f32.mrb[52].mxu0 }
 0x2fc   : > { %1605 = vst [vmem:[#allocation2 + $0x80] sm:$0xff] %v1573_v2  ;;  %v1575_v7 = vadd.f32 %v4842_v35, %v1530_v3  ;;  %v1439_v8 = vadd.f32 %v1438_v6, %v4826_v21  ;;  %v1440_v9 = vpop.f32.mrb[53].mxu0 }
 0x2fd   : > { %1606 = vst [vmem:[#allocation2 + $0x88] sm:$0xff] %v1574_v4  ;;  %v1576_v10 = vadd.f32 %v4846_v39, %v1531_v5  ;;  %v1441_v11 = vadd.f32 %v1440_v9, %v4830_v30  ;;  %v1442_v55 = vpop.f32.mrb[54].mxu0 }
 0x2fe   : > { %1607 = vst [vmem:[#allocation2 + $0x90] sm:$0xff] %v1575_v7  ;;  %v1487_v12 = vmax.f32 %v1439_v8, 0.0  ;;  %v1443_v13 = vadd.f32 %v1442_v55, %v4826_v21  ;;  %v1444_v14 = vpop.f32.mrb[55].mxu0 }
 0x2ff   : > { %1608 = vst [vmem:[#allocation2 + $0x98] sm:$0xff] %v1576_v10  ;;  %v1488_v15 = vmax.f32 %v1441_v11, 0.0  ;;  %v1445_v16 = vadd.f32 %v1444_v14, %v4830_v30 }
 0x300   : > { %v1532_v17 = vmul.f32 %v4835_v25, %v1487_v12  ;;  %v1489_v18 = vmax.f32 %v1443_v13, 0.0 }
 0x301   : > { %v1533_v19 = vmul.f32 %v4839_v32, %v1488_v15  ;;  %v1490_v20 = vmax.f32 %v1445_v16, 0.0 }
 0x302   : > { %v1577_v22 = vadd.f32 %v4842_v35, %v1532_v17  ;;  %v1534_v23 = vmul.f32 %v4835_v25, %v1489_v18 }
 0x303   : > { %v1578_v24 = vadd.f32 %v4846_v39, %v1533_v19  ;;  %v1535_v31 = vmul.f32 %v4839_v32, %v1490_v20  ;;  %v1448_v26 = vpop.f32.mrb[32].mxu1 }
 0x304   : > { %1609 = vst [vmem:[#allocation2 + $0xa0] sm:$0xff] %v1577_v22  ;;  %v1579_v28 = vadd.f32 %v4842_v35, %v1534_v23  ;;  %v1449_v33 = vadd.f32 %v1448_v26, %v4826_v21  ;;  %v1450_v34 = vpop.f32.mrb[33].mxu1 }
 0x305   : > { %1610 = vst [vmem:[#allocation2 + $0xa8] sm:$0xff] %v1578_v24  ;;  %v1580_v36 = vadd.f32 %v4846_v39, %v1535_v31  ;;  %v1451_v37 = vadd.f32 %v1450_v34, %v4830_v30  ;;  %v1452_v38 = vpop.f32.mrb[34].mxu1 }
 0x306   : > { %1611 = vst [vmem:[#allocation2 + $0xb0] sm:$0xff] %v1579_v28  ;;  %v1491_v40 = vmax.f32 %v1449_v33, 0.0  ;;  %v1453_v41 = vadd.f32 %v1452_v38, %v4826_v21  ;;  %v1454_v42 = vpop.f32.mrb[35].mxu1 }
 0x307   : > { %1612 = vst [vmem:[#allocation2 + $0xb8] sm:$0xff] %v1580_v36  ;;  %v1492_v43 = vmax.f32 %v1451_v37, 0.0  ;;  %v1455_v44 = vadd.f32 %v1454_v42, %v4830_v30 }
 0x308   : > { %v1536_v45 = vmul.f32 %v4835_v25, %v1491_v40  ;;  %v1493_v27 = vmax.f32 %v1453_v41, 0.0 }
 0x309   : > { %v1537_v46 = vmul.f32 %v4839_v32, %v1492_v43  ;;  %v1494_v47 = vmax.f32 %v1455_v44, 0.0 }
 0x30a   : > { %v1581_v48 = vadd.f32 %v4842_v35, %v1536_v45  ;;  %v1538_v29 = vmul.f32 %v4835_v25, %v1493_v27 }
 0x30b   : > { %v1582_v49 = vadd.f32 %v4846_v39, %v1537_v46  ;;  %v1539_v50 = vmul.f32 %v4839_v32, %v1494_v47  ;;  %v1458_v51 = vpop.f32.mrb[36].mxu1 }
 0x30c   : > { %1613 = vst [vmem:[#allocation2 + $0xc0] sm:$0xff] %v1581_v48  ;;  %v1583_v52 = vadd.f32 %v4842_v35, %v1538_v29  ;;  %v1459_v53 = vadd.f32 %v1458_v51, %v4826_v21  ;;  %v1460_v54 = vpop.f32.mrb[37].mxu1 }
 0x30d   : > { %1614 = vst [vmem:[#allocation2 + $0xc8] sm:$0xff] %v1582_v49  ;;  %v1584_v56 = vadd.f32 %v4846_v39, %v1539_v50  ;;  %v1461_v57 = vadd.f32 %v1460_v54, %v4830_v30  ;;  %v1462_v58 = vpop.f32.mrb[38].mxu1 }
 0x30e   : > { %1615 = vst [vmem:[#allocation2 + $0xd0] sm:$0xff] %v1583_v52  ;;  %v1495_v59 = vmax.f32 %v1459_v53, 0.0  ;;  %v1463_v60 = vadd.f32 %v1462_v58, %v4826_v21  ;;  %v1464_v61 = vpop.f32.mrb[39].mxu1 }
 0x30f   : > { %1616 = vst [vmem:[#allocation2 + $0xd8] sm:$0xff] %v1584_v56  ;;  %v1496_v62 = vmax.f32 %v1461_v57, 0.0  ;;  %v1465_v63 = vadd.f32 %v1464_v61, %v4830_v30 }
 0x310   : > { %v1540_v0 = vmul.f32 %v4835_v25, %v1495_v59  ;;  %v1497_v1 = vmax.f32 %v1463_v60, 0.0 }
 0x311   : > { %v1541_v2 = vmul.f32 %v4839_v32, %v1496_v62  ;;  %v1498_v3 = vmax.f32 %v1465_v63, 0.0 }
 0x312   : > { %v1585_v4 = vadd.f32 %v4842_v35, %v1540_v0  ;;  %v1542_v5 = vmul.f32 %v4835_v25, %v1497_v1 }
 0x313   : > { %v1586_v6 = vadd.f32 %v4846_v39, %v1541_v2  ;;  %v1543_v7 = vmul.f32 %v4839_v32, %v1498_v3 }
 0x314   : > { %1617 = vst [vmem:[#allocation2 + $0xe0] sm:$0xff] %v1585_v4  ;;  %v1587_v21 = vadd.f32 %v4842_v35, %v1542_v5 }
 0x315   : > { %1618 = vst [vmem:[#allocation2 + $0xe8] sm:$0xff] %v1586_v6  ;;  %v1588_v30 = vadd.f32 %v4846_v39, %v1543_v7 }
 0x316   : > { %1619 = vst [vmem:[#allocation2 + $0xf0] sm:$0xff] %v1587_v21 }
 0x317   : > { %1620 = vst [vmem:[#allocation2 + $0xf8] sm:$0xff] %v1588_v30 }
 0x318 PF: > { %p3770_p6 = scmp.ne.s32.totalorder %s4506_s18, 6 }
 0x319   : > { %v1627_v8 = vld [vmem:[#allocation2 + $0x8] sm:$0xff] (!%p3770_p6)  ;;  %v1629_v9 = vld [vmem:[#allocation2 + $0x18] sm:$0xff] (!%p3770_p6)  ;;  %v1626_v10 = vld [vmem:[#allocation2] sm:$0xff] (!%p3770_p6)  ;;  %v4439_v32 = vmov (!%p3770_p6), 0  }
 0x31a   : > { %1624 = sbr.rel (%p3770_p6) target bundleno = 2051 (0x803), region = 76  ;;  %v1659_v25 = vpack.c.bf16 (!%p3770_p6), %v1629_v9, %v1627_v8  ;;  %v1628_v11 = vld [vmem:[#allocation2 + $0x10] sm:$0xff] (!%p3770_p6)  ;;  %v1631_v55 = vld [vmem:[#allocation2 + $0x28] sm:$0xff] (!%p3770_p6)  ;;  %v1633_v12 = vld [vmem:[#allocation2 + $0x38] sm:$0xff] (!%p3770_p6)  ;;  %1706 = vmatprep.mubr.bf16.mxu1 (!%p3770_p6), %v4439_v32  ;;  %2351 = vmatprep.mubr.bf16.mxu0 (!%p3770_p6), %v4439_v32 }
 0x31b   : > { %v1658_v35 = vpack.c.bf16 (!%p3770_p6), %v1628_v11, %v1626_v10  ;;  %v1661_v39 = vpack.c.bf16 (!%p3770_p6), %v1633_v12, %v1631_v55  ;;  %v1630_v13 = vld [vmem:[#allocation2 + $0x20] sm:$0xff] (!%p3770_p6)  ;;  %v1632_v14 = vld [vmem:[#allocation2 + $0x30] sm:$0xff] (!%p3770_p6)  ;;  %v1635_v15 = vld [vmem:[#allocation2 + $0x48] sm:$0xff] (!%p3770_p6) }
 0x31c   : > { %1674 = vmatprep.subr.bf16.mxu1 (!%p3770_p6), %v1659_v25  ;;  %v1637_v16 = vld [vmem:[#allocation2 + $0x58] sm:$0xff] (!%p3770_p6)  ;;  %v1660_v17 = vpack.c.bf16 (!%p3770_p6), %v1632_v14, %v1630_v13  ;;  %v1634_v19 = vld [vmem:[#allocation2 + $0x40] sm:$0xff] (!%p3770_p6)  ;;  %v1636_v20 = vld [vmem:[#allocation2 + $0x50] sm:$0xff] (!%p3770_p6) }
 0x31d   : > { %1675 = vmatpush1.bf16.msra.mxu1 (!%p3770_p6), %v1658_v35  ;;  %v1663_v18 = vpack.c.bf16 (!%p3770_p6), %v1637_v16, %v1635_v15  ;;  %v1639_v22 = vld [vmem:[#allocation2 + $0x68] sm:$0xff] (!%p3770_p6)  ;;  %v1641_v23 = vld [vmem:[#allocation2 + $0x78] sm:$0xff] (!%p3770_p6)  ;;  %v1662_v24 = vpack.c.bf16 (!%p3770_p6), %v1636_v20, %v1634_v19  ;;  %v1638_v26 = vld [vmem:[#allocation2 + $0x60] sm:$0xff] (!%p3770_p6) }
 0x31e   : > { %1676 = vmatprep.subr.bf16.mxu1 (!%p3770_p6), %v1661_v39  ;;  %v1665_v31 = vpack.c.bf16 (!%p3770_p6), %v1641_v23, %v1639_v22  ;;  %v1640_v28 = vld [vmem:[#allocation2 + $0x70] sm:$0xff] (!%p3770_p6)  ;;  %v1643_v33 = vld [vmem:[#allocation2 + $0x88] sm:$0xff] (!%p3770_p6)  ;;  %v1645_v34 = vld [vmem:[#allocation2 + $0x98] sm:$0xff] (!%p3770_p6) }
 0x31f   : > { %v1642_v36 = vld [vmem:[#allocation2 + $0x80] sm:$0xff] (!%p3770_p6)  ;;  %v1664_v37 = vpack.c.bf16 (!%p3770_p6), %v1640_v28, %v1638_v26  ;;  %v1644_v38 = vld [vmem:[#allocation2 + $0x90] sm:$0xff] (!%p3770_p6)  ;;  %v1667_v40 = vpack.c.bf16 (!%p3770_p6), %v1645_v34, %v1643_v33  ;;  %v1647_v41 = vld [vmem:[#allocation2 + $0xa8] sm:$0xff] (!%p3770_p6) }
 0x320   : > { %v1649_v42 = vld [vmem:[#allocation2 + $0xb8] sm:$0xff] (!%p3770_p6)  ;;  %v1646_v43 = vld [vmem:[#allocation2 + $0xa0] sm:$0xff] (!%p3770_p6)  ;;  %v1666_v44 = vpack.c.bf16 (!%p3770_p6), %v1644_v38, %v1642_v36  ;;  %v1648_v45 = vld [vmem:[#allocation2 + $0xb0] sm:$0xff] (!%p3770_p6) }
 0x321   : > { %1677 = vmatpush1.bf16.msra.mxu1 %v1660_v17  ;;  %v1669_v27 = vpack.c.bf16 %v1649_v42, %v1647_v41  ;;  %v1651_v46 = vld [vmem:[#allocation2 + $0xc8] sm:$0xff]  ;;  %v1653_v47 = vld [vmem:[#allocation2 + $0xd8] sm:$0xff]  ;;  %v1650_v48 = vld [vmem:[#allocation2 + $0xc0] sm:$0xff]  ;;  %v1668_v29 = vpack.c.bf16 %v1648_v45, %v1646_v43 }
 0x322   : > { %1678 = vmatprep.subr.bf16.mxu1 %v1663_v18  ;;  %v1652_v49 = vld [vmem:[#allocation2 + $0xd0] sm:$0xff]  ;;  %v1671_v50 = vpack.c.bf16 %v1653_v47, %v1651_v46  ;;  %v1655_v51 = vld [vmem:[#allocation2 + $0xe8] sm:$0xff]  ;;  %v1657_v52 = vld [vmem:[#allocation2 + $0xf8] sm:$0xff] }
 0x323   : > { %v1654_v53 = vld [vmem:[#allocation2 + $0xe0] sm:$0xff]  ;;  %v1670_v54 = vpack.c.bf16 %v1652_v49, %v1650_v48  ;;  %v1656_v56 = vld [vmem:[#allocation2 + $0xf0] sm:$0xff]  ;;  %v1673_v57 = vpack.c.bf16 %v1657_v52, %v1655_v51  ;;  %v4208_v62 = vld [vmem:[%s5683_s6 + $0x48] sm:$0xff]  }
 0x324   : > { %v4206_v58 = vld [vmem:[%s5683_s6 + $0x40] sm:$0xff]   ;;  %v1672_v59 = vpack.c.bf16 %v1656_v56, %v1654_v53  ;;  %v4209_v63 = vld [vmem:[%s5683_s6 + $0x8] sm:$0xff]   ;;  %v4210_v0 = vld [vmem:[%s5683_s6 + $0x50] sm:$0xff]  }
 0x325   : > { %1679 = vmatpush1.bf16.msra.mxu1 %v1662_v24  ;;  %v1625_v60 = vld [vmem:[%s5682_s5] sm:$0xf]  ;;  %v4211_v1 = vld [vmem:[%s5683_s6 + $0x10] sm:$0xff]   ;;  %v4212_v2 = vld [vmem:[%s5683_s6 + $0x58] sm:$0xff]  }
 0x326   : > { %1680 = vmatprep.subr.bf16.mxu1 %v1665_v31  ;;  %v4207_v61 = vld [vmem:[%s5683_s6] sm:$0xff]   ;;  %v4213_v3 = vld [vmem:[%s5683_s6 + $0x18] sm:$0xff]   ;;  %v4216_v6 = vld [vmem:[%s5683_s6 + $0x68] sm:$0xff]  }
 0x327   : > { %v4214_v4 = vld [vmem:[%s5683_s6 + $0x60] sm:$0xff]   ;;  %v4217_v7 = vld [vmem:[%s5683_s6 + $0x28] sm:$0xff]   ;;  %v4218_v21 = vld [vmem:[%s5683_s6 + $0x70] sm:$0xff]  }
 0x328   : > { %v4215_v5 = vld [vmem:[%s5683_s6 + $0x20] sm:$0xff]   ;;  %v4219_v30 = vld [vmem:[%s5683_s6 + $0x30] sm:$0xff]   ;;  %v4220_v8 = vld [vmem:[%s5683_s6 + $0x78] sm:$0xff]  }
 0x329   : > { %1681 = vmatpush1.bf16.msra.mxu1 %v1664_v37  ;;  %v4221_v9 = vld [vmem:[%s5683_s6 + $0x38] sm:$0xff]   ;;  %v1892_v10 = vld [vmem:[%s5684_s7] sm:$0xff]  ;;  %v1893_v11 = vld [vmem:[%s5684_s7 + $0x8] sm:$0xff] }
 0x32a   : > { %1682 = vmatprep.subr.bf16.mxu1 %v1667_v40  ;;  %v1896_v25 = vld [vmem:[%s5684_s7 + $0x20] sm:$0xff]  ;;  %v1897_v12 = vld [vmem:[%s5684_s7 + $0x28] sm:$0xff] }
 0x32b   : > { %v3790_v55 = vcombine.high %v1892_v10, %v1896_v25  ;;  %v3789_v35 = vcombine.low %v1892_v10, %v1896_v25  ;;  %v1900_v39 = vld [vmem:[%s5684_s7 + $0x40] sm:$0xff]  ;;  %v3791_v14 = vcombine.low %v1893_v11, %v1897_v12  ;;  %v3792_v15 = vcombine.high %v1893_v11, %v1897_v12  ;;  %v1901_v43 = vld [vmem:[%s5684_s7 + $0x48] sm:$0xff] }
 0x32c   : > { %v1904_v13 = vld [vmem:[%s5684_s7 + $0x60] sm:$0xff]  ;;  %v1909_v49 = vld [vmem:[%s5684_s7 + $0x88] sm:$0xff] }
 0x32d   : > { %1683 = vmatpush1.bf16.msra.mxu1 %v1666_v44  ;;  %v3798_v16 = vcombine.high %v1900_v39, %v1904_v13  ;;  %2319 = vmatprep.subr.bf16.mxu0 %v3790_v55  ;;  %v3797_v17 = vcombine.low %v1900_v39, %v1904_v13  ;;  %v1908_v18 = vld [vmem:[%s5684_s7 + $0x80] sm:$0xff]  ;;  %v1905_v44 = vld [vmem:[%s5684_s7 + $0x68] sm:$0xff]  ;;  %v1894_v13 = vld [vmem:[%s5684_s7 + $0x10] sm:$0xff] }
 0x32e   : > { %1684 = vmatprep.subr.bf16.mxu1 %v1669_v27  ;;  %2320 = vmatpush1.bf16.msra.mxu0 %v3789_v35  ;;  %v1912_v19 = vld [vmem:[%s5684_s7 + $0xa0] sm:$0xff]  ;;  %v3799_v51 = vcombine.low %v1901_v43, %v1905_v44  ;;  %v1917_v53 = vld [vmem:[%s5684_s7 + $0xc8] sm:$0xff] }
 0x32f   : > { %2321 = vmatprep.subr.bf16.mxu0 %v3798_v16  ;;  %v3806_v20 = vcombine.high %v1908_v18, %v1912_v19  ;;  %v3805_v22 = vcombine.low %v1908_v18, %v1912_v19  ;;  %v1916_v23 = vld [vmem:[%s5684_s7 + $0xc0] sm:$0xff]  ;;  %v1949_v25 = vld [vmem:[%s5684_s7 + $0x1c8] sm:$0xff] }
 0x330   : > { %v1920_v24 = vld [vmem:[%s5684_s7 + $0xe0] sm:$0xff]  ;;  %v1953_v55 = vld [vmem:[%s5684_s7 + $0x1e8] sm:$0xff] }
 0x331   : > { %1685 = vmatpush1.bf16.msra.mxu1 %v1668_v29  ;;  %v3814_v31 = vcombine.high %v1916_v23, %v1920_v24  ;;  %v3813_v26 = vcombine.low %v1916_v23, %v1920_v24  ;;  %v1924_v28 = vld [vmem:[%s5684_s7 + $0x100] sm:$0xff]  ;;  %v3800_v29 = vcombine.high %v1901_v43, %v1905_v44  ;;  %v3847_v12 = vcombine.low %v1949_v25, %v1953_v55  ;;  %v1910_v44 = vld [vmem:[%s5684_s7 + $0x90] sm:$0xff] }
 0x332   : > { %1686 = vmatprep.subr.bf16.mxu1 %v1671_v50  ;;  %2322 = vmatpush1.bf16.msra.mxu0 %v3797_v17  ;;  %v1928_v33 = vld [vmem:[%s5684_s7 + $0x120] sm:$0xff]  ;;  %v1913_v50 = vld [vmem:[%s5684_s7 + $0xa8] sm:$0xff]  ;;  %v3848_v35 = vcombine.high %v1949_v25, %v1953_v55  ;;  %v1899_v17 = vld [vmem:[%s5684_s7 + $0x38] sm:$0xff] }
 0x333   : > { %2323 = vmatprep.subr.bf16.mxu0 %v3806_v20  ;;  %v3822_v34 = vcombine.high %v1924_v28, %v1928_v33  ;;  %v3821_v36 = vcombine.low %v1924_v28, %v1928_v33  ;;  %v1932_v37 = vld [vmem:[%s5684_s7 + $0x140] sm:$0xff]  ;;  %v3808_v52 = vcombine.high %v1909_v49, %v1913_v50  ;;  %v3807_v56 = vcombine.low %v1909_v49, %v1913_v50  ;;  %v1918_v50 = vld [vmem:[%s5684_s7 + $0xd0] sm:$0xff]  ;;  %v1947_v25 = vld [vmem:[%s5684_s7 + $0x1b8] sm:$0xff] }
 0x334   : > { %v1936_v38 = vld [vmem:[%s5684_s7 + $0x160] sm:$0xff] }
 0x335   : > { %1687 = vmatpush1.bf16.msra.mxu1 %v1670_v54  ;;  %v3830_v40 = vcombine.high %v1932_v37, %v1936_v38  ;;  %v3829_v41 = vcombine.low %v1932_v37, %v1936_v38  ;;  %v1921_v54 = vld [vmem:[%s5684_s7 + $0xe8] sm:$0xff]  ;;  %v1952_v10 = vld [vmem:[%s5684_s7 + $0x1e0] sm:$0xff]  ;;  %v1903_v37 = vld [vmem:[%s5684_s7 + $0x58] sm:$0xff] }
 0x336   : > { %1688 = vmatprep.subr.bf16.mxu1 %v1673_v57  ;;  %2324 = vmatpush1.bf16.msra.mxu0 %v3805_v22  ;;  %v3816_v57 = vcombine.high %v1917_v53, %v1921_v54  ;;  %v3771_v23 = vld [vmem:[%s5687_s10] ss:$0 sm:$0xff]  ;;  %v1907_v38 = vld [vmem:[%s5684_s7 + $0x78] sm:$0xff] }
 0x337   : > { %2325 = vmatprep.subr.bf16.mxu0 %v3814_v31  ;;  %v3804_v43 = vcombine.high %v1903_v37, %v1907_v38 }
 0x339   : > { %1689 = vmatpush1.bf16.msra.mxu1 %v1672_v59  ;;  %v1929_v59 = vld [vmem:[%s5684_s7 + $0x128] sm:$0xff] }
 0x33a   : > { %4004 = vmatprep.subr.bf16.mxu1 %v4206_v58  ;;  %2326 = vmatpush1.bf16.msra.mxu0 %v3813_v26  ;;  %v1925_v58 = vld [vmem:[%s5684_s7 + $0x108] sm:$0xff] }
 0x33b   : > { %2327 = vmatprep.subr.bf16.mxu0 %v3822_v34  ;;  %v1902_v34 = vld [vmem:[%s5684_s7 + $0x50] sm:$0xff] }
 0x33c   : > { %1707 = vmatmul.mubr.bf16.vlgmr.msra.gmra.mrb[0].mxu1 %v1625_v60  ;;  %v3815_v60 = vcombine.low %v1917_v53, %v1921_v54  ;;  %v1923_v53 = vld [vmem:[%s5684_s7 + $0xf8] sm:$0xff] }
 0x33d   : > { %4005 = vmatpush3.bf16.msra.mxu1 %v4207_v61  ;;  %v3824_v61 = vcombine.high %v1925_v58, %v1929_v59 }
 0x33e   : > { %4006 = vmatprep.subr.bf16.mxu1 %v4208_v62  ;;  %2328 = vmatpush1.bf16.msra.mxu0 %v3821_v36  ;;  %v1933_v62 = vld [vmem:[%s5684_s7 + $0x148] sm:$0xff]  ;;  %v1906_v36 = vld [vmem:[%s5684_s7 + $0x70] sm:$0xff] }
 0x33f   : > { %2329 = vmatprep.subr.bf16.mxu0 %v3830_v40 }
 0x341   : > { %4007 = vmatpush3.bf16.msra.mxu1 %v4209_v63  ;;  %v1937_v63 = vld [vmem:[%s5684_s7 + $0x168] sm:$0xff] }
 0x342   : > { %4008 = vmatprep.subr.bf16.mxu1 %v4210_v0  ;;  %2330 = vmatpush1.bf16.msra.mxu0 %v3829_v41  ;;  %v3823_v0 = vcombine.low %v1925_v58, %v1929_v59  ;;  %v1926_v59 = vld [vmem:[%s5684_s7 + $0x110] sm:$0xff] }
 0x345   : > { %4009 = vmatpush3.bf16.msra.mxu1 %v4211_v1  ;;  %v3832_v1 = vcombine.high %v1933_v62, %v1937_v63 }
 0x346   : > { %4010 = vmatprep.subr.bf16.mxu1 %v4212_v2  ;;  %v3831_v2 = vcombine.low %v1933_v62, %v1937_v63 }
 0x349   : > { %4011 = vmatpush3.bf16.msra.mxu1 %v4213_v3  ;;  %v1940_v3 = vld [vmem:[%s5684_s7 + $0x180] sm:$0xff] }
 0x34a   : > { %4012 = vmatprep.subr.bf16.mxu1 %v4214_v4  ;;  %v1944_v4 = vld [vmem:[%s5684_s7 + $0x1a0] sm:$0xff] }
 0x34d   : > { %4013 = vmatpush3.bf16.msra.mxu1 %v4215_v5  ;;  %v1941_v5 = vld [vmem:[%s5684_s7 + $0x188] sm:$0xff] }
 0x34e   : > { %4014 = vmatprep.subr.bf16.mxu1 %v4216_v6  ;;  %v3838_v6 = vcombine.high %v1940_v3, %v1944_v4 }
 0x350   : > { %2331 = vmatprep.subr.bf16.mxu0 %v3838_v6 }
 0x351   : > { %4015 = vmatpush3.bf16.msra.mxu1 %v4217_v7  ;;  %v1945_v7 = vld [vmem:[%s5684_s7 + $0x1a8] sm:$0xff] }
 0x352   : > { %4016 = vmatprep.subr.bf16.mxu1 %v4218_v21  ;;  %v3839_v21 = vcombine.low %v1941_v5, %v1945_v7 }
 0x355   : > { %4017 = vmatpush3.bf16.msra.mxu1 %v4219_v30  ;;  %v3840_v30 = vcombine.high %v1941_v5, %v1945_v7  ;;  %v1939_v5 = vld [vmem:[%s5684_s7 + $0x178] sm:$0xff] }
 0x356   : > { %4018 = vmatprep.subr.bf16.mxu1 %v4220_v8  ;;  %v3837_v8 = vcombine.low %v1940_v3, %v1944_v4  ;;  %v1938_v3 = vld [vmem:[%s5684_s7 + $0x170] sm:$0xff]  ;;  %v1935_v4 = vld [vmem:[%s5684_s7 + $0x158] sm:$0xff] }
 0x357   : > { %v3835_v55 = vcombine.low %v1935_v4, %v1939_v5 }
 0x358   : > { %2332 = vmatpush1.bf16.msra.mxu0 %v3837_v8  ;;  %v1942_v8 = vld [vmem:[%s5684_s7 + $0x190] sm:$0xff] }
 0x359   : > { %4019 = vmatpush3.bf16.msra.mxu1 %v4221_v9  ;;  %v1948_v9 = vld [vmem:[%s5684_s7 + $0x1c0] sm:$0xff] }
 0x35a   : > { %2360 = vmatprep.subr.bf16.mxu1 %v3792_v15  ;;  %v3846_v11 = vcombine.high %v1948_v9, %v1952_v10  ;;  %v3845_v39 = vcombine.low %v1948_v9, %v1952_v10  ;;  %v1895_v15 = vld [vmem:[%s5684_s7 + $0x18] sm:$0xff]  ;;  %v1946_v9 = vld [vmem:[%s5684_s7 + $0x1b0] sm:$0xff] }
 0x35b   : > { %v3795_v19 = vcombine.low %v1895_v15, %v1899_v17  ;;  %v3796_v20 = vcombine.high %v1895_v15, %v1899_v17  ;;  %v1943_v10 = vld [vmem:[%s5684_s7 + $0x198] sm:$0xff] }
 0x35c   : > { %2333 = vmatprep.subr.bf16.mxu0 %v3846_v11  ;;  %v1955_v15 = vld [vmem:[%s5684_s7 + $0x1f8] sm:$0xff]  ;;  %v3843_v17 = vcombine.low %v1943_v10, %v1947_v25 }
 0x35d   : > { %2334 = vmatpush1.bf16.msra.mxu0 %v3845_v39  ;;  %v1950_v39 = vld [vmem:[%s5684_s7 + $0x1d0] sm:$0xff] }
 0x40f   : > { %v1708_v42 = vpop.f32.mrb[0].mxu1 }
 0x410   : > { %v1710_v45 = vpop.f32.mrb[1].mxu1  ;;  %v1715_v47 = vpack.c.bf16 %v1708_v42, %v1708_v42  ;;  %v3802_v42 = vcombine.high %v1902_v34, %v1906_v36 }
 0x411   : > { %v1716_v27 = vpack.c.bf16 %v1710_v45, %v1710_v45  ;;  %v1712_v46 = vpop.f32.mrb[2].mxu1  ;;  %v1914_v45 = vld [vmem:[%s5684_s7 + $0xb0] sm:$0xff] }
 0x412   : > { %v1713_v48 = vpop.f32.mrb[3].mxu1  ;;  %v1915_v46 = vld [vmem:[%s5684_s7 + $0xb8] sm:$0xff]  ;;  %v3809_v54 = vcombine.low %v1910_v44, %v1914_v45 }
 0x413   : > { %1882 = vmatprep.mubr.bf16.mxu1 %v1716_v27  ;;  %v1911_v27 = vld [vmem:[%s5684_s7 + $0x98] sm:$0xff]  ;;  %v3803_v48 = vcombine.low %v1903_v37, %v1907_v38  ;;  %v4236_v37 = vld [vmem:[%s5685_s8 + $0x124] ss:$8 sps:$4 sm:$0xff]  }
 0x414   : > { %1883 = vmatmul.mubr.bf16.vlgmr.msra.gmra.mrb[4].mxu1 %v1715_v47  ;;  %v3801_v47 = vcombine.low %v1902_v34, %v1906_v36  ;;  %v3812_v49 = vcombine.high %v1911_v27, %v1915_v46  ;;  %v4228_v34 = vld [vmem:[%s5685_s8 + $0x110] ss:$8 sps:$4 sm:$0xff]   ;;  %v4239_v38 = vld [vmem:[%s5685_s8 + $0x24] ss:$8 sps:$4 sm:$0xff]  }
 0x415   : > { %2361 = vmatpush1.bf16.msra.mxu1 %v3791_v14  ;;  %2392 = vmatprep.mubr.bf16.mxu1 %v4439_v32  ;;  %v1898_v14 = vld [vmem:[%s5684_s7 + $0x30] sm:$0xff] }
 0x416   : > { %2362 = vmatprep.subr.bf16.mxu1 %v3800_v29  ;;  %v3794_v16 = vcombine.high %v1894_v13, %v1898_v14  ;;  %v3793_v18 = vcombine.low %v1894_v13, %v1898_v14  ;;  %v3810_v29 = vcombine.high %v1910_v44, %v1914_v45  ;;  %v1954_v13 = vld [vmem:[%s5684_s7 + $0x1f0] sm:$0xff]  ;;  %v1951_v14 = vld [vmem:[%s5684_s7 + $0x1d8] sm:$0xff] }
 0x417   : > { %v4231_v36 = vld [vmem:[%s5685_s8 + $0x10] ss:$8 sps:$4 sm:$0xff]  }
 0x418   : > { %2401 = vmatprep.subr.bf16.mxu0 %v3794_v16  ;;  %v3841_v16 = vcombine.low %v1942_v8, %v1946_v9  ;;  %v4240_v44 = vld [vmem:[%s5685_s8 + $0x130] ss:$8 sps:$4 sm:$0xff]  }
 0x419   : > { %2363 = vmatpush1.bf16.msra.mxu1 %v3799_v51  ;;  %v1922_v51 = vld [vmem:[%s5684_s7 + $0xf0] sm:$0xff] }
 0x41a   : > { %2364 = vmatprep.subr.bf16.mxu1 %v3808_v52  ;;  %v1919_v52 = vld [vmem:[%s5684_s7 + $0xd8] sm:$0xff]  ;;  %v3817_v62 = vcombine.low %v1918_v50, %v1922_v51 }
 0x41b   : > { %v3820_v58 = vcombine.high %v1919_v52, %v1923_v53  ;;  %v3819_v63 = vcombine.low %v1919_v52, %v1923_v53  ;;  %v4243_v45 = vld [vmem:[%s5685_s8 + $0x30] ss:$8 sps:$4 sm:$0xff]   ;;  %v4260_v52 = vld [vmem:[%s5685_s8 + $0x164] ss:$8 sps:$4 sm:$0xff]  }
 0x41c   : > { %v4263_v53 = vld [vmem:[%s5685_s8 + $0x64] ss:$8 sps:$4 sm:$0xff]  }
 0x41d   : > { %2365 = vmatpush1.bf16.msra.mxu1 %v3807_v56  ;;  %v3811_v56 = vcombine.low %v1911_v27, %v1915_v46  ;;  %v4248_v27 = vld [vmem:[%s5685_s8 + $0x144] ss:$8 sps:$4 sm:$0xff]  }
 0x41e   : > { %2366 = vmatprep.subr.bf16.mxu1 %v3816_v57  ;;  %v3818_v57 = vcombine.high %v1918_v50, %v1922_v51  ;;  %v4251_v46 = vld [vmem:[%s5685_s8 + $0x44] ss:$8 sps:$4 sm:$0xff]   ;;  %v4252_v50 = vld [vmem:[%s5685_s8 + $0x150] ss:$8 sps:$4 sm:$0xff]  }
 0x41f   : > { %v4255_v51 = vld [vmem:[%s5685_s8 + $0x50] ss:$8 sps:$4 sm:$0xff]  }
 0x421   : > { %2367 = vmatpush1.bf16.msra.mxu1 %v3815_v60  ;;  %v1930_v60 = vld [vmem:[%s5684_s7 + $0x130] sm:$0xff] }
 0x422   : > { %2368 = vmatprep.subr.bf16.mxu1 %v3824_v61  ;;  %v1931_v61 = vld [vmem:[%s5684_s7 + $0x138] sm:$0xff]  ;;  %v3825_v6 = vcombine.low %v1926_v59, %v1930_v60 }
 0x425   : > { %2369 = vmatpush1.bf16.msra.mxu1 %v3823_v0  ;;  %v3826_v0 = vcombine.high %v1926_v59, %v1930_v60  ;;  %v4264_v59 = vld [vmem:[%s5685_s8 + $0x170] ss:$8 sps:$4 sm:$0xff]  }
 0x426   : > { %2370 = vmatprep.subr.bf16.mxu1 %v3832_v1  ;;  %v4267_v60 = vld [vmem:[%s5685_s8 + $0x70] ss:$8 sps:$4 sm:$0xff]  }
 0x429   : > { %2371 = vmatpush1.bf16.msra.mxu1 %v3831_v2  ;;  %v1934_v2 = vld [vmem:[%s5684_s7 + $0x150] sm:$0xff] }
 0x42a   : > { %2372 = vmatprep.subr.bf16.mxu1 %v3840_v30  ;;  %v3836_v30 = vcombine.high %v1935_v4, %v1939_v5  ;;  %v3833_v11 = vcombine.low %v1934_v2, %v1938_v3  ;;  %v4284_v4 = vld [vmem:[%s5685_s8 + $0x1a4] ss:$8 sps:$4 sm:$0xff]  }
 0x42b   : > { %v4287_v5 = vld [vmem:[%s5685_s8 + $0xa4] ss:$8 sps:$4 sm:$0xff]  }
 0x42d   : > { %2373 = vmatpush1.bf16.msra.mxu1 %v3839_v21  ;;  %v3834_v21 = vcombine.high %v1934_v2, %v1938_v3  ;;  %v4276_v2 = vld [vmem:[%s5685_s8 + $0x190] ss:$8 sps:$4 sm:$0xff]  }
 0x42e   : > { %2374 = vmatprep.subr.bf16.mxu1 %v3848_v35  ;;  %v3844_v35 = vcombine.high %v1943_v10, %v1947_v25  ;;  %v4279_v3 = vld [vmem:[%s5685_s8 + $0x90] ss:$8 sps:$4 sm:$0xff]   ;;  %v4296_v10 = vld [vmem:[%s5685_s8 + $0x1c4] ss:$8 sps:$4 sm:$0xff]  }
 0x42f   : > { %v4299_v25 = vld [vmem:[%s5685_s8 + $0xc4] ss:$8 sps:$4 sm:$0xff]  }
 0x431   : > { %2375 = vmatpush1.bf16.msra.mxu1 %v3847_v12  ;;  %v3842_v12 = vcombine.high %v1942_v8, %v1946_v9  ;;  %v4288_v8 = vld [vmem:[%s5685_s8 + $0x1b0] ss:$8 sps:$4 sm:$0xff]  }
 0x432   : > { %2442 = vmatprep.subr.bf16.mxu1 %v3796_v20  ;;  %v3849_v20 = vcombine.low %v1950_v39, %v1954_v13  ;;  %v4291_v9 = vld [vmem:[%s5685_s8 + $0xb0] ss:$8 sps:$4 sm:$0xff]  }
 0x4e7   : > { %v4020_v22 = vpop.f32.mrb[4].mxu1 }
 0x4e8   : > { %v4021_v24 = vpop.f32.mrb[5].mxu1 }
 0x4e9   : > { %v4022_v31 = vadd.f32 %v4021_v24, %v4020_v22  ;;  %v4023_v26 = vpop.f32.mrb[6].mxu1  ;;  %v3851_v22 = vcombine.low %v1951_v14, %v1955_v15  ;;  %v4227_v24 = vld [vmem:[%s5685_s8 + $0x4] ss:$8 sps:$4 sm:$0xff]  }
 0x4ea   : > { %v4024_v28 = vpop.f32.mrb[7].mxu1  ;;  %v4225_v26 = vld [vmem:[%s5685_s8] ss:$8 sps:$4 sm:$0xff]  }
 0x4eb   : > { %v1885_v33 = vadd.f32 %v4022_v31, %v3771_v23  ;;  %v4224_v23 = vld [vmem:[%s5685_s8 + $0x104] ss:$8 sps:$4 sm:$0xff]   ;;  %v4222_v31 = vld [vmem:[%s5685_s8 + $0x100] ss:$8 sps:$4 sm:$0xff]   ;;  %v4230_v28 = vld [vmem:[%s5685_s8 + $0x114] ss:$8 sps:$4 sm:$0xff]  }
 0x4ed   : > { %v1890_v40 = vmax.f32 %v1885_v33, 0.0  ;;  %v4233_v33 = vld [vmem:[%s5685_s8 + $0x14] ss:$8 sps:$4 sm:$0xff]  }
 0x4ef   : > { %v5119_v41 = vpack.c.bf16 %v1890_v40, %v1890_v40  ;;  %v4234_v40 = vld [vmem:[%s5685_s8 + $0x120] ss:$8 sps:$4 sm:$0xff]  }
 0x4f1   : > { %2352 = vmatmul.mubr.bf16.vlgmr.msra.gmra.mrb[0].mxu0 %v5119_v41  ;;  %2393 = vmatmul.mubr.bf16.vlgmr.msra.gmra.mrb[8].mxu1 %v5119_v41 }
 0x4f2   : > { %2402 = vmatpush1.bf16.msra.mxu0 %v3793_v18  ;;  %2443 = vmatpush1.bf16.msra.mxu1 %v3795_v19  ;;  %v3850_v18 = vcombine.high %v1950_v39, %v1954_v13  ;;  %v3852_v19 = vcombine.high %v1951_v14, %v1955_v15  ;;  %v4300_v39 = vld [vmem:[%s5685_s8 + $0x1d0] ss:$8 sps:$4 sm:$0xff]   ;;  %v4308_v14 = vld [vmem:[%s5685_s8 + $0x1e4] ss:$8 sps:$4 sm:$0xff]  }
 0x4f3   : > { %2403 = vmatprep.subr.bf16.mxu0 %v3802_v42  ;;  %2444 = vmatprep.subr.bf16.mxu1 %v3804_v43  ;;  %v4242_v42 = vld [vmem:[%s5685_s8 + $0x134] ss:$8 sps:$4 sm:$0xff]   ;;  %v4303_v13 = vld [vmem:[%s5685_s8 + $0xd0] ss:$8 sps:$4 sm:$0xff]   ;;  %v4311_v15 = vld [vmem:[%s5685_s8 + $0xe4] ss:$8 sps:$4 sm:$0xff]  }
 0x4f4   : > { %2433 = vmatprep.mubr.bf16.mxu0 %v4439_v32  ;;  %2474 = vmatprep.mubr.bf16.mxu1 %v4439_v32  ;;  %v1927_v32 = vld [vmem:[%s5684_s7 + $0x118] sm:$0xff] }
 0x4f5   : > { %v3828_v1 = vcombine.high %v1927_v32, %v1931_v61  ;;  %v3827_v7 = vcombine.low %v1927_v32, %v1931_v61  ;;  %v4245_v43 = vld [vmem:[%s5685_s8 + $0x34] ss:$8 sps:$4 sm:$0xff]   ;;  %v4272_v32 = vld [vmem:[%s5685_s8 + $0x184] ss:$8 sps:$4 sm:$0xff]  }
 0x4f6   : > { %2404 = vmatpush1.bf16.msra.mxu0 %v3801_v47  ;;  %2445 = vmatpush1.bf16.msra.mxu1 %v3803_v48  ;;  %v4246_v47 = vld [vmem:[%s5685_s8 + $0x140] ss:$8 sps:$4 sm:$0xff]   ;;  %v4275_v61 = vld [vmem:[%s5685_s8 + $0x84] ss:$8 sps:$4 sm:$0xff]  }
 0x4f7   : > { %2405 = vmatprep.subr.bf16.mxu0 %v3810_v29  ;;  %2446 = vmatprep.subr.bf16.mxu1 %v3812_v49  ;;  %v4249_v48 = vld [vmem:[%s5685_s8 + $0x40] ss:$8 sps:$4 sm:$0xff]   ;;  %v4254_v29 = vld [vmem:[%s5685_s8 + $0x154] ss:$8 sps:$4 sm:$0xff]  }
 0x4f8   : > { %v4257_v49 = vld [vmem:[%s5685_s8 + $0x54] ss:$8 sps:$4 sm:$0xff]  }
 0x4fa   : > { %2406 = vmatpush1.bf16.msra.mxu0 %v3809_v54  ;;  %2447 = vmatpush1.bf16.msra.mxu1 %v3811_v56  ;;  %v4258_v54 = vld [vmem:[%s5685_s8 + $0x160] ss:$8 sps:$4 sm:$0xff]  }
 0x4fb   : > { %2407 = vmatprep.subr.bf16.mxu0 %v3818_v57  ;;  %2448 = vmatprep.subr.bf16.mxu1 %v3820_v58  ;;  %v4261_v56 = vld [vmem:[%s5685_s8 + $0x60] ss:$8 sps:$4 sm:$0xff]   ;;  %v4266_v57 = vld [vmem:[%s5685_s8 + $0x174] ss:$8 sps:$4 sm:$0xff]  }
 0x4fc   : > { %v4269_v58 = vld [vmem:[%s5685_s8 + $0x74] ss:$8 sps:$4 sm:$0xff]  }
 0x4fe   : > { %2408 = vmatpush1.bf16.msra.mxu0 %v3817_v62  ;;  %2449 = vmatpush1.bf16.msra.mxu1 %v3819_v63  ;;  %v4270_v62 = vld [vmem:[%s5685_s8 + $0x180] ss:$8 sps:$4 sm:$0xff]  }
 0x4ff   : > { %2409 = vmatprep.subr.bf16.mxu0 %v3826_v0  ;;  %2450 = vmatprep.subr.bf16.mxu1 %v3828_v1  ;;  %v4273_v63 = vld [vmem:[%s5685_s8 + $0x80] ss:$8 sps:$4 sm:$0xff]   ;;  %v4278_v0 = vld [vmem:[%s5685_s8 + $0x194] ss:$8 sps:$4 sm:$0xff]  }
 0x500   : > { %v4281_v1 = vld [vmem:[%s5685_s8 + $0x94] ss:$8 sps:$4 sm:$0xff]  }
 0x502   : > { %2410 = vmatpush1.bf16.msra.mxu0 %v3825_v6  ;;  %2451 = vmatpush1.bf16.msra.mxu1 %v3827_v7  ;;  %v4282_v6 = vld [vmem:[%s5685_s8 + $0x1a0] ss:$8 sps:$4 sm:$0xff]  }
 0x503   : > { %2411 = vmatprep.subr.bf16.mxu0 %v3834_v21  ;;  %2452 = vmatprep.subr.bf16.mxu1 %v3836_v30  ;;  %v4285_v7 = vld [vmem:[%s5685_s8 + $0xa0] ss:$8 sps:$4 sm:$0xff]   ;;  %v4290_v21 = vld [vmem:[%s5685_s8 + $0x1b4] ss:$8 sps:$4 sm:$0xff]  }
 0x504   : > { %v4293_v30 = vld [vmem:[%s5685_s8 + $0xb4] ss:$8 sps:$4 sm:$0xff]  }
 0x506   : > { %2412 = vmatpush1.bf16.msra.mxu0 %v3833_v11  ;;  %2453 = vmatpush1.bf16.msra.mxu1 %v3835_v55  ;;  %v4294_v11 = vld [vmem:[%s5685_s8 + $0x1c0] ss:$8 sps:$4 sm:$0xff]  }
 0x507   : > { %2413 = vmatprep.subr.bf16.mxu0 %v3842_v12  ;;  %2454 = vmatprep.subr.bf16.mxu1 %v3844_v35  ;;  %v4297_v55 = vld [vmem:[%s5685_s8 + $0xc0] ss:$8 sps:$4 sm:$0xff]   ;;  %v4302_v12 = vld [vmem:[%s5685_s8 + $0x1d4] ss:$8 sps:$4 sm:$0xff]  }
 0x508   : > { %v4305_v35 = vld [vmem:[%s5685_s8 + $0xd4] ss:$8 sps:$4 sm:$0xff]  }
 0x50a   : > { %2414 = vmatpush1.bf16.msra.mxu0 %v3841_v16  ;;  %2455 = vmatpush1.bf16.msra.mxu1 %v3843_v17  ;;  %v4306_v16 = vld [vmem:[%s5685_s8 + $0x1e0] ss:$8 sps:$4 sm:$0xff]  }
 0x50b   : > { %2415 = vmatprep.subr.bf16.mxu0 %v3850_v18  ;;  %2456 = vmatprep.subr.bf16.mxu1 %v3852_v19  ;;  %v4309_v17 = vld [vmem:[%s5685_s8 + $0xe0] ss:$8 sps:$4 sm:$0xff]   ;;  %v4314_v18 = vld [vmem:[%s5685_s8 + $0x1f4] ss:$8 sps:$4 sm:$0xff]  }
 0x50c   : > { %v4317_v19 = vld [vmem:[%s5685_s8 + $0xf4] ss:$8 sps:$4 sm:$0xff]  }
 0x50e   : > { %2416 = vmatpush1.bf16.msra.mxu0 %v3849_v20  ;;  %2457 = vmatpush1.bf16.msra.mxu1 %v3851_v22  ;;  %v4312_v20 = vld [vmem:[%s5685_s8 + $0x1f0] ss:$8 sps:$4 sm:$0xff]  }
 0x50f   : > { %3321 = vmatprep.subr.bf16.mxu0 %v4224_v23  ;;  %3280 = vmatprep.subr.bf16.mxu1 %v4227_v24  ;;  %v4315_v22 = vld [vmem:[%s5685_s8 + $0xf0] ss:$8 sps:$4 sm:$0xff]   ;;  %v4320_v23 = vld [vmem:[%s5685_s8 + $0x204] ss:$8 sps:$4 sm:$0xff]   ;;  %v1959_v24 = vlaneseq }
 0x511   : > { %2434 = vmatmul.mubr.bf16.vlgmr.msra.gmra.mrb[4].mxu0 %v5119_v41  ;;  %2475 = vmatmul.mubr.bf16.vlgmr.msra.gmra.mrb[12].mxu1 %v5119_v41  ;;  %v4237_v41 = vld [vmem:[%s5685_s8 + $0x20] ss:$8 sps:$4 sm:$0xff]  }
 0x512   : > { %3322 = vmatpush1.bf16.msra.mxu0 %v4222_v31  ;;  %3281 = vmatpush1.bf16.msra.mxu1 %v4225_v26  ;;  %v5394_v31 = vshrl.u32 %v1959_v24, 7  ;;  %v4348_v24 = vld [vmem:[%s5685_s8 + $0x2a0] ss:$8 sps:$4 sm:$0xff]  }
 0x513   : > { %3323 = vmatprep.subr.bf16.mxu0 %v4230_v28  ;;  %3282 = vmatprep.subr.bf16.mxu1 %v4233_v33  ;;  %v5401_v33 = vld [vmem:[%s5687_s10 + $0x1] ss:$4 sm:$0xff] }
 0x514   : > { %v1961_v26 = vsub.s32 0, %v5394_v31  ;;  %v1969_v28 = vsub.s32 2, %v5394_v31 }
 0x516   : > { %3324 = vmatpush1.bf16.msra.mxu0 %v4228_v34  ;;  %3283 = vmatpush1.bf16.msra.mxu1 %v4231_v36  ;;  %v1965_v34 = vsub.s32 1, %v5394_v31  ;;  %v1973_v36 = vsub.s32 3, %v5394_v31 }
 0x517   : > { %3325 = vmatprep.subr.bf16.mxu0 %v4236_v37  ;;  %3284 = vmatprep.subr.bf16.mxu1 %v4239_v38  ;;  %v1962_v37 = vrot.slane %v5401_v33, %v1961_v26  ;;  %v1970_v38 = vrot.slane %v5401_v33, %v1969_v28  ;;  %v4353_v28 = vld [vmem:[%s5685_s8 + $0x2b4] ss:$8 sps:$4 sm:$0xff]  }
 0x51a   : > { %3326 = vmatpush1.bf16.msra.mxu0 %v4234_v40  ;;  %3285 = vmatpush1.bf16.msra.mxu1 %v4237_v41  ;;  %v1966_v40 = vrot.slane %v5401_v33, %v1965_v34  ;;  %v1974_v41 = vrot.slane %v5401_v33, %v1973_v36  ;;  %v4351_v36 = vld [vmem:[%s5685_s8 + $0x2b0] ss:$8 sps:$4 sm:$0xff]  }
 0x51b   : > { %3327 = vmatprep.subr.bf16.mxu0 %v4242_v42  ;;  %3286 = vmatprep.subr.bf16.mxu1 %v4245_v43 }
 0x51e   : > { %3328 = vmatpush1.bf16.msra.mxu0 %v4240_v44  ;;  %3287 = vmatpush1.bf16.msra.mxu1 %v4243_v45 }
 0x51f   : > { %3329 = vmatprep.subr.bf16.mxu0 %v4248_v27  ;;  %3288 = vmatprep.subr.bf16.mxu1 %v4251_v46 }
 0x522   : > { %3330 = vmatpush1.bf16.msra.mxu0 %v4246_v47  ;;  %3289 = vmatpush1.bf16.msra.mxu1 %v4249_v48 }
 0x523   : > { %3331 = vmatprep.subr.bf16.mxu0 %v4254_v29  ;;  %3290 = vmatprep.subr.bf16.mxu1 %v4257_v49 }
 0x526   : > { %3332 = vmatpush1.bf16.msra.mxu0 %v4252_v50  ;;  %3291 = vmatpush1.bf16.msra.mxu1 %v4255_v51 }
 0x527   : > { %3333 = vmatprep.subr.bf16.mxu0 %v4260_v52  ;;  %3292 = vmatprep.subr.bf16.mxu1 %v4263_v53 }
 0x52a   : > { %3334 = vmatpush1.bf16.msra.mxu0 %v4258_v54  ;;  %3293 = vmatpush1.bf16.msra.mxu1 %v4261_v56 }
 0x52b   : > { %3335 = vmatprep.subr.bf16.mxu0 %v4266_v57  ;;  %3294 = vmatprep.subr.bf16.mxu1 %v4269_v58 }
 0x52e   : > { %3336 = vmatpush1.bf16.msra.mxu0 %v4264_v59  ;;  %3295 = vmatpush1.bf16.msra.mxu1 %v4267_v60  ;;  %v4318_v59 = vld [vmem:[%s5685_s8 + $0x200] ss:$8 sps:$4 sm:$0xff]  }
 0x52f   : > { %3337 = vmatprep.subr.bf16.mxu0 %v4272_v32  ;;  %3296 = vmatprep.subr.bf16.mxu1 %v4275_v61  ;;  %v4323_v61 = vld [vmem:[%s5685_s8 + $0x214] ss:$8 sps:$4 sm:$0xff]  }
 0x532   : > { %3338 = vmatpush1.bf16.msra.mxu0 %v4270_v62  ;;  %3297 = vmatpush1.bf16.msra.mxu1 %v4273_v63  ;;  %v4321_v62 = vld [vmem:[%s5685_s8 + $0x210] ss:$8 sps:$4 sm:$0xff]   ;;  %v4326_v63 = vld [vmem:[%s5685_s8 + $0x224] ss:$8 sps:$4 sm:$0xff]  }
 0x533   : > { %3339 = vmatprep.subr.bf16.mxu0 %v4278_v0  ;;  %3298 = vmatprep.subr.bf16.mxu1 %v4281_v1  ;;  %v4324_v0 = vld [vmem:[%s5685_s8 + $0x220] ss:$8 sps:$4 sm:$0xff]   ;;  %v4329_v1 = vld [vmem:[%s5685_s8 + $0x234] ss:$8 sps:$4 sm:$0xff]  }
 0x536   : > { %3340 = vmatpush1.bf16.msra.mxu0 %v4276_v2  ;;  %3299 = vmatpush1.bf16.msra.mxu1 %v4279_v3  ;;  %v4327_v2 = vld [vmem:[%s5685_s8 + $0x230] ss:$8 sps:$4 sm:$0xff]   ;;  %v4332_v3 = vld [vmem:[%s5685_s8 + $0x244] ss:$8 sps:$4 sm:$0xff]  }
 0x537   : > { %3341 = vmatprep.subr.bf16.mxu0 %v4284_v4  ;;  %3300 = vmatprep.subr.bf16.mxu1 %v4287_v5  ;;  %v4330_v4 = vld [vmem:[%s5685_s8 + $0x240] ss:$8 sps:$4 sm:$0xff]   ;;  %v4335_v5 = vld [vmem:[%s5685_s8 + $0x254] ss:$8 sps:$4 sm:$0xff]  }
 0x53a   : > { %3342 = vmatpush1.bf16.msra.mxu0 %v4282_v6  ;;  %3301 = vmatpush1.bf16.msra.mxu1 %v4285_v7  ;;  %v4333_v6 = vld [vmem:[%s5685_s8 + $0x250] ss:$8 sps:$4 sm:$0xff]   ;;  %v1981_v7 = vsub.s32 5, %v5394_v31 }
 0x53b   : > { %3343 = vmatprep.subr.bf16.mxu0 %v4290_v21  ;;  %3302 = vmatprep.subr.bf16.mxu1 %v4293_v30  ;;  %v4338_v21 = vld [vmem:[%s5685_s8 + $0x264] ss:$8 sps:$4 sm:$0xff]  }
 0x53c   : > { %v1982_v30 = vrot.slane %v5401_v33, %v1981_v7  ;;  %v4416_v7 = vld [vmem:[%s5686_s9 + $0x48] sm:$0xff]  }
 0x53e   : > { %3344 = vmatpush1.bf16.msra.mxu0 %v4288_v8  ;;  %3303 = vmatpush1.bf16.msra.mxu1 %v4291_v9  ;;  %v4336_v8 = vld [vmem:[%s5685_s8 + $0x260] ss:$8 sps:$4 sm:$0xff]   ;;  %v4341_v9 = vld [vmem:[%s5685_s8 + $0x274] ss:$8 sps:$4 sm:$0xff]  }
 0x53f   : > { %3345 = vmatprep.subr.bf16.mxu0 %v4296_v10  ;;  %3304 = vmatprep.subr.bf16.mxu1 %v4299_v25 }
 0x542   : > { %3346 = vmatpush1.bf16.msra.mxu0 %v4294_v11  ;;  %3305 = vmatpush1.bf16.msra.mxu1 %v4297_v55 }
 0x543   : > { %3347 = vmatprep.subr.bf16.mxu0 %v4302_v12  ;;  %3306 = vmatprep.subr.bf16.mxu1 %v4305_v35 }
 0x546   : > { %3348 = vmatpush1.bf16.msra.mxu0 %v4300_v39  ;;  %3307 = vmatpush1.bf16.msra.mxu1 %v4303_v13  ;;  %v4339_v13 = vld [vmem:[%s5685_s8 + $0x270] ss:$8 sps:$4 sm:$0xff]  }
 0x547   : > { %3349 = vmatprep.subr.bf16.mxu0 %v4308_v14  ;;  %3308 = vmatprep.subr.bf16.mxu1 %v4311_v15 }
 0x54a   : > { %3350 = vmatpush1.bf16.msra.mxu0 %v4306_v16  ;;  %3309 = vmatpush1.bf16.msra.mxu1 %v4309_v17  ;;  %v4344_v16 = vld [vmem:[%s5685_s8 + $0x284] ss:$8 sps:$4 sm:$0xff]  }
 0x54b   : > { %3351 = vmatprep.subr.bf16.mxu0 %v4314_v18  ;;  %3310 = vmatprep.subr.bf16.mxu1 %v4317_v19  ;;  %v4342_v19 = vld [vmem:[%s5685_s8 + $0x280] ss:$8 sps:$4 sm:$0xff]  }
 0x54e   : > { %3352 = vmatpush1.bf16.msra.mxu0 %v4312_v20  ;;  %3311 = vmatpush1.bf16.msra.mxu1 %v4315_v22  ;;  %v4347_v20 = vld [vmem:[%s5685_s8 + $0x294] ss:$8 sps:$4 sm:$0xff]   ;;  %v4345_v22 = vld [vmem:[%s5685_s8 + $0x290] ss:$8 sps:$4 sm:$0xff]  }
 0x54f   : > { %3362 = vmatprep.subr.bf16.mxu0 %v4320_v23  ;;  %v4350_v23 = vld [vmem:[%s5685_s8 + $0x2a4] ss:$8 sps:$4 sm:$0xff]  }
 0x5c4   : > { %v2353_v42 = vpop.f32.mrb[0].mxu0  ;;  %v2394_v43 = vpop.f32.mrb[8].mxu1 }
 0x5c5   : > { %v2354_v44 = vadd.f32 %v2353_v42, %v1962_v37  ;;  %v2395_v45 = vadd.f32 %v2394_v43, %v1970_v38  ;;  %v2355_v27 = vpop.f32.mrb[1].mxu0  ;;  %v2396_v46 = vpop.f32.mrb[9].mxu1  ;;  %v4356_v37 = vld [vmem:[%s5685_s8 + $0x2c4] ss:$8 sps:$4 sm:$0xff]   ;;  %v4354_v38 = vld [vmem:[%s5685_s8 + $0x2c0] ss:$8 sps:$4 sm:$0xff]  }
 0x5c6   : > { %v2356_v47 = vadd.f32 %v2355_v27, %v1966_v40  ;;  %v2397_v48 = vadd.f32 %v2396_v46, %v1974_v41  ;;  %v2357_v29 = vpop.f32.mrb[2].mxu0  ;;  %v2398_v49 = vpop.f32.mrb[10].mxu1  ;;  %v1977_v40 = vsub.s32 4, %v5394_v31  ;;  %v4359_v41 = vld [vmem:[%s5685_s8 + $0x2d4] ss:$8 sps:$4 sm:$0xff]   ;;  %v1989_v42 = vsub.s32 7, %v5394_v31 }
 0x5c7   : > { %v2483_v50 = vmax.f32 %v2354_v44, 0.0  ;;  %v2485_v51 = vmax.f32 %v2395_v45, 0.0  ;;  %v2358_v52 = vpop.f32.mrb[3].mxu0  ;;  %v2399_v53 = vpop.f32.mrb[11].mxu1  ;;  %v4357_v43 = vld [vmem:[%s5685_s8 + $0x2d0] ss:$8 sps:$4 sm:$0xff]  }
 0x5c8   : > { %v2484_v54 = vmax.f32 %v2356_v47, 0.0  ;;  %v2486_v56 = vmax.f32 %v2397_v48, 0.0  ;;  %v1978_v44 = vrot.slane %v5401_v33, %v1977_v40  ;;  %v4362_v45 = vld [vmem:[%s5685_s8 + $0x2e4] ss:$8 sps:$4 sm:$0xff]   ;;  %v1990_v27 = vrot.slane %v5401_v33, %v1989_v42  ;;  %v4360_v46 = vld [vmem:[%s5685_s8 + $0x2e0] ss:$8 sps:$4 sm:$0xff]  }
 0x5c9   : > { %v2491_v60 = vpack.c.bf16 %v2483_v50, %v2483_v50  ;;  %v2493_v32 = vpack.c.bf16 %v2485_v51, %v2485_v51  ;;  %v4365_v48 = vld [vmem:[%s5685_s8 + $0x2f4] ss:$8 sps:$4 sm:$0xff]   ;;  %v4363_v49 = vld [vmem:[%s5685_s8 + $0x2f0] ss:$8 sps:$4 sm:$0xff]   ;;  %v4368_v51 = vld [vmem:[%s5685_s8 + $0x304] ss:$8 sps:$4 sm:$0xff]  }
 0x5ca   : > { %v2492_v57 = vpack.c.bf16 %v2484_v54, %v2484_v54  ;;  %v2494_v58 = vpack.c.bf16 %v2486_v56, %v2486_v56  ;;  %v4366_v53 = vld [vmem:[%s5685_s8 + $0x300] ss:$8 sps:$4 sm:$0xff]   ;;  %v4371_v56 = vld [vmem:[%s5685_s8 + $0x314] ss:$8 sps:$4 sm:$0xff]  }
 0x5cb   : > { %v4408_v40 = vld [vmem:[%s5685_s8 + $0x3e0] ss:$8 sps:$4 sm:$0xff]   ;;  %v4413_v42 = vld [vmem:[%s5685_s8 + $0x3f4] ss:$8 sps:$4 sm:$0xff]  }
 0x5cc   : > { %3312 = vmatprep.mubr.bf16.mxu1 %v2492_v57  ;;  %3353 = vmatprep.mubr.bf16.mxu0 %v2494_v58  ;;  %v4369_v58 = vld [vmem:[%s5685_s8 + $0x310] ss:$8 sps:$4 sm:$0xff]  }
 0x5cd   : > { %3313 = vmatmul.mubr.bf16.vlgmr.msra.gmra.mrb[16].mxu1 %v2491_v60  ;;  %3354 = vmatmul.mubr.bf16.vlgmr.msra.gmra.mrb[8].mxu0 %v2493_v32  ;;  %v4372_v60 = vld [vmem:[%s5685_s8 + $0x320] ss:$8 sps:$4 sm:$0xff]   ;;  %v4377_v32 = vld [vmem:[%s5685_s8 + $0x334] ss:$8 sps:$4 sm:$0xff]  }
 0x5ce   : > { %3363 = vmatpush1.bf16.msra.mxu0 %v4318_v59  ;;  %v4374_v59 = vld [vmem:[%s5685_s8 + $0x324] ss:$8 sps:$4 sm:$0xff]  }
 0x5cf   : > { %3364 = vmatprep.subr.bf16.mxu0 %v4323_v61  ;;  %v4375_v61 = vld [vmem:[%s5685_s8 + $0x330] ss:$8 sps:$4 sm:$0xff]  }
 0x5d2   : > { %3365 = vmatpush1.bf16.msra.mxu0 %v4321_v62  ;;  %v4380_v62 = vld [vmem:[%s5685_s8 + $0x344] ss:$8 sps:$4 sm:$0xff]  }
 0x5d3   : > { %3366 = vmatprep.subr.bf16.mxu0 %v4326_v63  ;;  %v4378_v63 = vld [vmem:[%s5685_s8 + $0x340] ss:$8 sps:$4 sm:$0xff]  }
 0x5d6   : > { %3367 = vmatpush1.bf16.msra.mxu0 %v4324_v0  ;;  %v4383_v0 = vld [vmem:[%s5685_s8 + $0x354] ss:$8 sps:$4 sm:$0xff]  }
 0x5d7   : > { %3368 = vmatprep.subr.bf16.mxu0 %v4329_v1  ;;  %v4381_v1 = vld [vmem:[%s5685_s8 + $0x350] ss:$8 sps:$4 sm:$0xff]  }
 0x5da   : > { %3369 = vmatpush1.bf16.msra.mxu0 %v4327_v2  ;;  %v4386_v2 = vld [vmem:[%s5685_s8 + $0x364] ss:$8 sps:$4 sm:$0xff]  }
 0x5db   : > { %3370 = vmatprep.subr.bf16.mxu0 %v4332_v3  ;;  %v4384_v3 = vld [vmem:[%s5685_s8 + $0x360] ss:$8 sps:$4 sm:$0xff]  }
 0x5de   : > { %3371 = vmatpush1.bf16.msra.mxu0 %v4330_v4  ;;  %v4389_v4 = vld [vmem:[%s5685_s8 + $0x374] ss:$8 sps:$4 sm:$0xff]  }
 0x5df   : > { %3372 = vmatprep.subr.bf16.mxu0 %v4335_v5  ;;  %v4414_v5 = vld [vmem:[%s5686_s9 + $0x40] sm:$0xff]  }
 0x5e0   : > { %4026 = vmatprep.subr.bf16.mxu1 %v4414_v5 }
 0x5e2   : > { %3373 = vmatpush1.bf16.msra.mxu0 %v4333_v6  ;;  %v4415_v6 = vld [vmem:[%s5686_s9] sm:$0xff]  }
 0x5e3   : > { %3374 = vmatprep.subr.bf16.mxu0 %v4338_v21  ;;  %v4387_v21 = vld [vmem:[%s5685_s8 + $0x370] ss:$8 sps:$4 sm:$0xff]   ;;  %4027 = vmatpush3.bf16.msra.mxu1 %v4415_v6 }
 0x5e4   : > { %v2435_v10 = vpop.f32.mrb[4].mxu0  ;;  %v5457_v25 = vpop.f32.mrb[12].mxu1  ;;  %4028 = vmatprep.subr.bf16.mxu1 %v4416_v7 }
 0x5e5   : > { %v2437_v11 = vpop.f32.mrb[5].mxu0  ;;  %v2478_v55 = vpop.f32.mrb[13].mxu1  ;;  %v2436_v47 = vadd.f32 %v2435_v10, %v1978_v44  ;;  %v4390_v10 = vld [vmem:[%s5685_s8 + $0x380] ss:$8 sps:$4 sm:$0xff]  }
 0x5e6   : > { %v2438_v12 = vadd.f32 %v2437_v11, %v1982_v30  ;;  %v2439_v35 = vpop.f32.mrb[6].mxu0  ;;  %v2480_v39 = vpop.f32.mrb[14].mxu1  ;;  %3375 = vmatpush1.bf16.msra.mxu0 %v4336_v8  ;;  %v2479_v29 = vadd.f32 %v2478_v55, %v1990_v27  ;;  %v4417_v30 = vld [vmem:[%s5686_s9 + $0x8] sm:$0xff]   ;;  %v4419_v11 = vld [vmem:[%s5686_s9 + $0x10] sm:$0xff]  }
 0x5e7   : > { %v2440_v14 = vpop.f32.mrb[7].mxu0  ;;  %v2481_v15 = vpop.f32.mrb[15].mxu1  ;;  %3376 = vmatprep.subr.bf16.mxu0 %v4341_v9  ;;  %v2487_v50 = vmax.f32 %v2436_v47, 0.0  ;;  %v4392_v8 = vld [vmem:[%s5685_s8 + $0x384] ss:$8 sps:$4 sm:$0xff]   ;;  %v4418_v9 = vld [vmem:[%s5686_s9 + $0x50] sm:$0xff]   ;;  %4029 = vmatpush3.bf16.msra.mxu1 %v4417_v30 }
 0x5e8   : > { %v2488_v17 = vmax.f32 %v2438_v12, 0.0  ;;  %v2490_v52 = vmax.f32 %v2479_v29, 0.0  ;;  %v4395_v55 = vld [vmem:[%s5685_s8 + $0x394] ss:$8 sps:$4 sm:$0xff]   ;;  %4030 = vmatprep.subr.bf16.mxu1 %v4418_v9  ;;  %v4393_v35 = vld [vmem:[%s5685_s8 + $0x390] ss:$8 sps:$4 sm:$0xff]  }
 0x5e9   : > { %v2495_v54 = vpack.c.bf16 %v2487_v50, %v2487_v50  ;;  %v4420_v12 = vld [vmem:[%s5686_s9 + $0x58] sm:$0xff]   ;;  %v4422_v14 = vld [vmem:[%s5686_s9 + $0x60] sm:$0xff]   ;;  %v4427_v27 = vld [vmem:[%s5686_s9 + $0x30] sm:$0xff]  }
 0x5ea   : > { %v2496_v18 = vpack.c.bf16 %v2488_v17, %v2488_v17  ;;  %3377 = vmatpush1.bf16.msra.mxu0 %v4339_v13  ;;  %v2498_v57 = vpack.c.bf16 %v2490_v52, %v2490_v52  ;;  %v4421_v39 = vld [vmem:[%s5686_s9 + $0x18] sm:$0xff]   ;;  %v4398_v13 = vld [vmem:[%s5685_s8 + $0x3a4] ss:$8 sps:$4 sm:$0xff]   ;;  %v4396_v15 = vld [vmem:[%s5685_s8 + $0x3a0] ss:$8 sps:$4 sm:$0xff]  }
 0x5eb   : > { %3378 = vmatprep.subr.bf16.mxu0 %v4344_v16  ;;  %4031 = vmatpush3.bf16.msra.mxu1 %v4419_v11  ;;  %v4423_v16 = vld [vmem:[%s5686_s9 + $0x20] sm:$0xff]   ;;  %v4401_v17 = vld [vmem:[%s5685_s8 + $0x3b4] ss:$8 sps:$4 sm:$0xff]  }
 0x5ec   : > { %3394 = vmatprep.mubr.bf16.mxu0 %v2496_v18  ;;  %4032 = vmatprep.subr.bf16.mxu1 %v4420_v12  ;;  %v4424_v18 = vld [vmem:[%s5686_s9 + $0x68] sm:$0xff]   ;;  %v4428_v29 = vld [vmem:[%s5686_s9 + $0x78] sm:$0xff]   ;;  %v3853_v50 = vld [vmem:[%s5687_s10 + $0x2] ss:$4 sm:$0x3] }
 0x5ed   : > { %v2637_v52 = vrot.slane %v3853_v50, %v1965_v34 }
 0x5ee   : > { %3379 = vmatpush1.bf16.msra.mxu0 %v4342_v19  ;;  %v4399_v19 = vld [vmem:[%s5685_s8 + $0x3b0] ss:$8 sps:$4 sm:$0xff]  }
 0x5ef   : > { %3380 = vmatprep.subr.bf16.mxu0 %v4347_v20  ;;  %4033 = vmatpush3.bf16.msra.mxu1 %v4421_v39  ;;  %v4425_v20 = vld [vmem:[%s5686_s9 + $0x28] sm:$0xff]  }
 0x5f0   : > { %4034 = vmatprep.subr.bf16.mxu1 %v4422_v14 }
 0x5f2   : > { %3381 = vmatpush1.bf16.msra.mxu0 %v4345_v22  ;;  %v4404_v22 = vld [vmem:[%s5685_s8 + $0x3c4] ss:$8 sps:$4 sm:$0xff]  }
 0x5f3   : > { %3382 = vmatprep.subr.bf16.mxu0 %v4350_v23  ;;  %4035 = vmatpush3.bf16.msra.mxu1 %v4423_v16  ;;  %v4402_v23 = vld [vmem:[%s5685_s8 + $0x3c0] ss:$8 sps:$4 sm:$0xff]  }
 0x5f4   : > { %4036 = vmatprep.subr.bf16.mxu1 %v4424_v18 }
 0x5f6   : > { %3383 = vmatpush1.bf16.msra.mxu0 %v4348_v24  ;;  %v1985_v24 = vsub.s32 6, %v5394_v31  ;;  %v3982_v31 = vld [vmem:[%s5687_s10 + $0x3] ss:$0 sm:$0xff] }
 0x5f7   : > { %3384 = vmatprep.subr.bf16.mxu0 %v4353_v28  ;;  %4037 = vmatpush3.bf16.msra.mxu1 %v4425_v20  ;;  %v4407_v28 = vld [vmem:[%s5685_s8 + $0x3d4] ss:$8 sps:$4 sm:$0xff]  }
 0x5fa   : > { %3385 = vmatpush1.bf16.msra.mxu0 %v4351_v36  ;;  %v4405_v36 = vld [vmem:[%s5685_s8 + $0x3d0] ss:$8 sps:$4 sm:$0xff]  }
 0x5fb   : > { %3386 = vmatprep.subr.bf16.mxu0 %v4356_v37  ;;  %v1986_v37 = vrot.slane %v5401_v33, %v1985_v24  ;;  %v4411_v33 = vld [vmem:[%s5685_s8 + $0x3f0] ss:$8 sps:$4 sm:$0xff]  }
 0x5fe   : > { %3387 = vmatpush1.bf16.msra.mxu0 %v4354_v38  ;;  %v4410_v38 = vld [vmem:[%s5685_s8 + $0x3e4] ss:$8 sps:$4 sm:$0xff]  }
 0x5ff   : > { %3388 = vmatprep.subr.bf16.mxu0 %v4359_v41  ;;  %v2477_v41 = vadd.f32 %v5457_v25, %v1986_v37 }
 0x602   : > { %3389 = vmatpush1.bf16.msra.mxu0 %v4357_v43  ;;  %v2489_v43 = vmax.f32 %v2477_v41, 0.0 }
 0x603   : > { %3390 = vmatprep.subr.bf16.mxu0 %v4362_v45  ;;  %v4426_v45 = vld [vmem:[%s5686_s9 + $0x70] sm:$0xff]  }
 0x604   : > { %v2497_v44 = vpack.c.bf16 %v2489_v43, %v2489_v43  ;;  %4038 = vmatprep.subr.bf16.mxu1 %v4426_v45 }
 0x605   : > { %4039 = vmatpush3.bf16.msra.mxu1 %v4427_v27 }
 0x606   : > { %3391 = vmatpush1.bf16.msra.mxu0 %v4360_v46  ;;  %4040 = vmatprep.subr.bf16.mxu1 %v4428_v29 }
 0x607   : > { %3392 = vmatprep.subr.bf16.mxu0 %v4365_v48 }
 0x60a   : > { %3393 = vmatpush1.bf16.msra.mxu0 %v4363_v49  ;;  %v4429_v49 = vld [vmem:[%s5686_s9 + $0x38] sm:$0xff]  }
 0x60b   : > { %3403 = vmatprep.subr.bf16.mxu0 %v4368_v51  ;;  %4041 = vmatpush3.bf16.msra.mxu1 %v4429_v49  ;;  %v2633_v51 = vrot.slane %v3853_v50, %v1961_v26 }
 0x60d   : > { %3395 = vmatmul.mubr.bf16.vlgmr.msra.gmra.mrb[8].mxu0 %v2495_v54 }
 0x60e   : > { %3404 = vmatpush1.bf16.msra.mxu0 %v4366_v53  ;;  %3435 = vmatprep.mubr.bf16.mxu0 %v2498_v57 }
 0x60f   : > { %3405 = vmatprep.subr.bf16.mxu0 %v4371_v56 }
 0x612   : > { %3406 = vmatpush1.bf16.msra.mxu0 %v4369_v58 }
 0x613   : > { %3407 = vmatprep.subr.bf16.mxu0 %v4374_v59 }
 0x616   : > { %3408 = vmatpush1.bf16.msra.mxu0 %v4372_v60 }
 0x617   : > { %3409 = vmatprep.subr.bf16.mxu0 %v4377_v32 }
 0x61a   : > { %3410 = vmatpush1.bf16.msra.mxu0 %v4375_v61 }
 0x61b   : > { %3411 = vmatprep.subr.bf16.mxu0 %v4380_v62 }
 0x61e   : > { %3412 = vmatpush1.bf16.msra.mxu0 %v4378_v63 }
 0x61f   : > { %3413 = vmatprep.subr.bf16.mxu0 %v4383_v0 }
 0x622   : > { %3414 = vmatpush1.bf16.msra.mxu0 %v4381_v1 }
 0x623   : > { %3415 = vmatprep.subr.bf16.mxu0 %v4386_v2 }
 0x626   : > { %3416 = vmatpush1.bf16.msra.mxu0 %v4384_v3 }
 0x627   : > { %3417 = vmatprep.subr.bf16.mxu0 %v4389_v4 }
 0x62a   : > { %3418 = vmatpush1.bf16.msra.mxu0 %v4387_v21 }
 0x62b   : > { %3419 = vmatprep.subr.bf16.mxu0 %v4392_v8 }
 0x62e   : > { %3420 = vmatpush1.bf16.msra.mxu0 %v4390_v10 }
 0x62f   : > { %3421 = vmatprep.subr.bf16.mxu0 %v4395_v55 }
 0x632   : > { %3422 = vmatpush1.bf16.msra.mxu0 %v4393_v35 }
 0x633   : > { %3423 = vmatprep.subr.bf16.mxu0 %v4398_v13 }
 0x636   : > { %3424 = vmatpush1.bf16.msra.mxu0 %v4396_v15 }
 0x637   : > { %3425 = vmatprep.subr.bf16.mxu0 %v4401_v17 }
 0x63a   : > { %3426 = vmatpush1.bf16.msra.mxu0 %v4399_v19 }
 0x63b   : > { %3427 = vmatprep.subr.bf16.mxu0 %v4404_v22 }
 0x63e   : > { %3428 = vmatpush1.bf16.msra.mxu0 %v4402_v23 }
 0x63f   : > { %3429 = vmatprep.subr.bf16.mxu0 %v4407_v28 }
 0x642   : > { %3430 = vmatpush1.bf16.msra.mxu0 %v4405_v36 }
 0x643   : > { %3431 = vmatprep.subr.bf16.mxu0 %v4410_v38 }
 0x646   : > { %3432 = vmatpush1.bf16.msra.mxu0 %v4408_v40 }
 0x647   : > { %3433 = vmatprep.subr.bf16.mxu0 %v4413_v42 }
 0x64a   : > { %3434 = vmatpush1.bf16.msra.mxu0 %v4411_v33 }
 0x64d   : > { %3436 = vmatmul.mubr.bf16.vlgmr.msra.gmra.mrb[8].mxu0 %v2497_v44 }
 0x6a0   : > { %v3314_v25 = vpop.f32.mrb[16].mxu1 }
 0x6a1   : > { %v3316_v46 = vpop.f32.mrb[17].mxu1  ;;  %v3315_v53 = vadd.f32 %v3314_v25, %v2633_v51 }
 0x6a2   : > { %v3318_v47 = vpop.f32.mrb[18].mxu1  ;;  %v3317_v54 = vadd.f32 %v3316_v46, %v2637_v52 }
 0x6a3   : > { %v3319_v48 = vpop.f32.mrb[19].mxu1 }
 0x720   : > { %v3437_v56 = vpop.f32.mrb[8].mxu0 }
 0x721   : > { %v4081_v57 = vadd.f32 %v3437_v56, %v3315_v53  ;;  %v3439_v58 = vpop.f32.mrb[9].mxu0 }
 0x722   : > { %v4083_v59 = vadd.f32 %v3439_v58, %v3317_v54  ;;  %v3441_v60 = vpop.f32.mrb[10].mxu0 }
 0x723   : > { %v3444_v32 = vmax.f32 %v4081_v57, 0.0  ;;  %v3442_v61 = vpop.f32.mrb[11].mxu0 }
 0x724   : > { %v3445_v62 = vmax.f32 %v4083_v59, 0.0 }
 0x725   : > { %v3446_v0 = vpack.c.bf16 %v3444_v32, %v3444_v32 }
 0x726   : > { %v3447_v63 = vpack.c.bf16 %v3445_v62, %v3445_v62 }
 0x728   : > { %3613 = vmatprep.mubr.bf16.mxu1 %v3447_v63 }
 0x729   : > { %3614 = vmatmul.mubr.bf16.vlgmr.msra.gmra.mrb[20].mxu1 %v3446_v0 }
 0x7fc   : > { %v4042_v1 = vpop.f32.mrb[20].mxu1 }
 0x7fd   : > { %v4043_v26 = vpop.f32.mrb[21].mxu1 }
 0x7fe   : > { %v4044_v34 = vadd.f32 %v4043_v26, %v4042_v1  ;;  %v4045_v2 = vpop.f32.mrb[22].mxu1 }
 0x7ff   : > { %v4046_v3 = vpop.f32.mrb[23].mxu1 }
 0x800   : > { %v3616_v4 = vadd.f32 %v4044_v34, %v3982_v31 }
 0x802   : > { %3621 = vst [vmem:[%s5688_s11] sm:$0xff] %v3616_v4 }
 0x803 PF: > { %s21_s17 = sadd.s32 1, %s4436_s17  }
 0x804   : > { %p18_p7 = scmp.ge.s32.totalorder %s21_s17, 9  }
 0x806   :  { %20 = sbr.rel (!%p18_p7) target bundleno = 1 (0x1), region = 113 }

</bundles_post_ra>
